<compile_context>
chip_gen: v6e
topology: v6e:2x2x1
jax: 0.10.0
libtpu: 0.0.40
codegen_flags: <defaults>
</compile_context>

<pallas_src>
import numpy as np
import jax
import jax.numpy as jnp
from jax import lax
from jax.experimental import pallas as pl
from jax.experimental.pallas import tpu as pltpu

ACTIONS = list(range(0, 2001, 10))               # len == 201
NUM_ACTIONS = len(ACTIONS)
N_PAD = ((NUM_ACTIONS + 127) // 128) * 128       # 256: lane-dense fc2 output

WEIGHT_DTYPE = jnp.bfloat16                      # HBM storage / MXU input dtype

# Architecture constants (fixed by the PyTorch module).
C1_OUT, K1H, K1W, S1 = 32, 8, 8, 4
C2_OUT, K2H, K2W, S2 = 64, 4, 4, 2
C3_OUT, K3H, K3W, S3 = 64, 3, 3, 1
FC1_OUT = 512


# ---------------------------------------------------------------------------
# Fused Pallas kernel: conv1 -> conv2 -> conv3 -> fc1 -> fc2 entirely in VMEM.
# All matmuls take bf16 operands and accumulate in f32 (preferred_element_type);
# bias add + ReLU run in f32 on the VPU.
# ---------------------------------------------------------------------------
def _dqn_fused_kernel(p1_ref, w1_ref, b1_ref, w2_ref, b2_ref, w3_ref, b3_ref,
                      w4_ref, b4_ref, w5_ref, b5_ref, o_ref):
    n_tap2 = w2_ref.shape[0] // C1_OUT           # conv2 taps: 4*4 = 16
    n_pos3 = w3_ref.shape[0] // C2_OUT           # conv3 taps == conv2 positions = 9
    batch = o_ref.shape[0]
    rows_t = n_pos3 * batch                      # rows per conv2-tap block: 9*B

    # conv1: one GEMM over the pre-duplicated im2col rows, + bias + ReLU.
    a1 = jnp.dot(p1_ref[...], w1_ref[...], preferred_element_type=jnp.float32)
    a1 = jnp.maximum(a1 + b1_ref[...], 0.0)      # (n_tap2*rows_t, 32) f32

    # conv2: single K-merged GEMM (K = 16*32 = 512).  Tap t's activations are
    # the contiguous row block [t*rows_t, (t+1)*rows_t); moving taps from rows
    # to lanes yields the lane-dense (rows_t, 512) LHS matching w2's packing.
    x2 = jnp.concatenate(
        [a1[t * rows_t:(t + 1) * rows_t, :] for t in range(n_tap2)], axis=1)
    a2 = jnp.dot(x2.astype(w2_ref.dtype), w2_ref[...],
                 preferred_element_type=jnp.float32)
    a2 = jnp.maximum(a2 + b2_ref[...], 0.0)      # (rows_t, 64), rows = (pos, b)

    # conv3: single K-merged GEMM (K = 9*64 = 576).  Because conv3's output is
    # 1x1, regrouping conv2's rows (pos, b) into (b, pos*64+ci) is exactly the
    # torch `.view(B, -1)` layout and the GEMM consumes it directly.
    x3 = jnp.concatenate(
        [a2[k * batch:(k + 1) * batch, :] for k in range(n_pos3)], axis=1)
    a3 = jnp.dot(x3.astype(w3_ref.dtype), w3_ref[...],
                 preferred_element_type=jnp.float32)
    a3 = jnp.maximum(a3 + b3_ref[...], 0.0)      # (B, 64)

    # fc1 (+ReLU) and fc2 (N padded to 256 so the HBM store is lane-dense).
    a4 = jnp.dot(a3.astype(w4_ref.dtype), w4_ref[...],
                 preferred_element_type=jnp.float32)
    a4 = jnp.maximum(a4 + b4_ref[...], 0.0)      # (B, 512)
    out = jnp.dot(a4.astype(w5_ref.dtype), w5_ref[...],
                  preferred_element_type=jnp.float32) + b5_ref[...]
    o_ref[...] = out.astype(o_ref.dtype)


# ---------------------------------------------------------------------------
# XLA-side glue on the raw input only: duplicated conv1 im2col patches, built
# with static slices/reshapes (no runtime gather).  Row order (tap2, pos2, b),
# column order (c, kh1, kw1).  Uses S1*S2 == K1H == K1W == 8: within each
# conv2-tap sub-image the conv1 windows tile into non-overlapping 8x8 blocks.
# ---------------------------------------------------------------------------
def _build_patches(x, oh2, ow2):
    B, C, _, _ = x.shape
    step = S1 * S2                                       # 8
    blocks = []
    for i2 in range(K2H):
        for j2 in range(K2W):
            sub = x[:, :,
                    S1 * i2:S1 * i2 + step * oh2,
                    S1 * j2:S1 * j2 + step * ow2]        # (B, C, 8*oh2, 8*ow2)
            sub = sub.reshape(B, C, oh2, K1H, ow2, K1W)
            sub = sub.transpose(2, 4, 0, 1, 3, 5)        # (oh2, ow2, B, C, 8, 8)
            blocks.append(sub.reshape(oh2 * ow2 * B, C * K1H * K1W))
    return jnp.concatenate(blocks, axis=0)               # (16*oh2*ow2*B, C*64)


# ---------------------------------------------------------------------------
# Forward builder (all shape math is static, done once at trace time).
# ---------------------------------------------------------------------------
def make_dqn_forward(c, h, w, batch):
    size = lambda a, k, s: (a - k) // s + 1
    oh1, ow1 = size(h, K1H, S1), size(w, K1W, S1)
    oh2, ow2 = size(oh1, K2H, S2), size(ow1, K2W, S2)
    oh3, ow3 = size(oh2, K3H, S3), size(ow2, K3W, S3)
    assert oh3 == 1 and ow3 == 1, "fused kernel assumes conv3 output is 1x1"
    assert oh2 == K3H and ow2 == K3W
    assert S1 * S2 == K1H and S1 * S2 == K1W
    assert S1 * (K2H - 1) + S1 * S2 * oh2 <= h
    assert S1 * (K2W - 1) + S1 * S2 * ow2 <= w
    # TODO(synk): oh3*ow3 > 1 would additionally need the NCHW channel-major
    # flatten before fc1; not required for the geometry exercised here.

    full2d = lambda shape: pl.BlockSpec(shape, lambda i: (0, 0))

    def forward(packed, x):
        patches = _build_patches(x, oh2, ow2).astype(WEIGHT_DTYPE)
        operands = (patches, packed["w1"], packed["b1"], packed["w2"],
                    packed["b2"], packed["w3"], packed["b3"], packed["w4"],
                    packed["b4"], packed["w5"], packed["b5"])
        out = pl.pallas_call(
            _dqn_fused_kernel,
            out_shape=jax.ShapeDtypeStruct((batch, N_PAD), jnp.float32),
            grid=(1,),
            in_specs=[full2d(a.shape) for a in operands],
            out_specs=pl.BlockSpec((batch, N_PAD), lambda i: (0, 0)),
            compiler_params=pltpu.CompilerParams(
                dimension_semantics=("arbitrary",)),
        )(*operands)
        return out[:, :NUM_ACTIONS]

    return forward


# ---------------------------------------------------------------------------
# Parameters (PyTorch layout) + one-time packing into kernel layout.
# ---------------------------------------------------------------------------
def init_dqn_params(key, c, h, w):
    size = lambda x, y, z: int((x - y) / z + 1)
    oh = size(size(size(h, 8, 4), 4, 2), 3, 1)
    ow = size(size(size(w, 8, 4), 4, 2), 3, 1)
    lin_in = 64 * oh * ow

    ks = jax.random.split(key, 10)

    def winit(k, shape, fan_in):
        return jax.random.normal(k, shape, jnp.float32) / jnp.sqrt(jnp.float32(fan_in))

    return {
        "conv1_w": winit(ks[0], (32, c, 8, 8), c * 8 * 8),
        "conv1_b": winit(ks[1], (32,), c * 8 * 8),
        "conv2_w": winit(ks[2], (64, 32, 4, 4), 32 * 4 * 4),
        "conv2_b": winit(ks[3], (64,), 32 * 4 * 4),
        "conv3_w": winit(ks[4], (64, 64, 3, 3), 64 * 3 * 3),
        "conv3_b": winit(ks[5], (64,), 64 * 3 * 3),
        "fc1_w": winit(ks[6], (512, lin_in), lin_in),     # PyTorch Linear: (out, in)
        "fc1_b": winit(ks[7], (512,), lin_in),
        "fc2_w": winit(ks[8], (NUM_ACTIONS, 512), 512),
        "fc2_b": winit(ks[9], (NUM_ACTIONS,), 512),
    }


def pack_params(params):
    """One-time packing: pre-transpose / K-merge every weight into the exact
    (K, N) layout the fused kernel consumes, and cast weights to bf16 for HBM
    storage (biases stay f32; all matmuls still accumulate in f32)."""
    c = params["conv1_w"].shape[1]
    w1 = params["conv1_w"].reshape(C1_OUT, c * K1H * K1W).T            # (C*64, 32)
    w2 = params["conv2_w"].transpose(2, 3, 1, 0).reshape(
        K2H * K2W * C1_OUT, C2_OUT)                                    # (512, 64) tap-major
    w3 = params["conv3_w"].transpose(2, 3, 1, 0).reshape(
        K3H * K3W * C2_OUT, C3_OUT)                                    # (576, 64) pos-major
    w4 = params["fc1_w"].T                                             # (64, 512)
    w5 = jnp.pad(params["fc2_w"], ((0, N_PAD - NUM_ACTIONS), (0, 0))).T  # (512, 256)
    b5 = jnp.pad(params["fc2_b"], (0, N_PAD - NUM_ACTIONS)).reshape(1, N_PAD)
    q = lambda a: a.astype(WEIGHT_DTYPE)
    return {
        "w1": q(w1), "b1": params["conv1_b"].reshape(1, C1_OUT),
        "w2": q(w2), "b2": params["conv2_b"].reshape(1, C2_OUT),
        "w3": q(w3), "b3": params["conv3_b"].reshape(1, C3_OUT),
        "w4": q(w4), "b4": params["fc1_b"].reshape(1, FC1_OUT),
        "w5": q(w5), "b5": b5,
    }


# ---------------------------------------------------------------------------
# Pure-f32 JAX reference (true module semantics) for the parity self-check.
# ---------------------------------------------------------------------------
def dqn_forward_ref(params, x):
    dn = ("NCHW", "OIHW", "NCHW")
    hp = lax.Precision.HIGHEST

    def conv(x, w, b, s):
        y = lax.conv_general_dilated(x, w, (s, s), "VALID",
                                     dimension_numbers=dn, precision=hp)
        return jnp.maximum(y + b.reshape(1, -1, 1, 1), 0.0)

    x = conv(x, params["conv1_w"], params["conv1_b"], 4)
    x = conv(x, params["conv2_w"], params["conv2_b"], 2)
    x = conv(x, params["conv3_w"], params["conv3_b"], 1)
    x = x.reshape(x.shape[0], -1)
    x = jnp.maximum(jnp.dot(x, params["fc1_w"].T, precision=hp) + params["fc1_b"], 0.0)
    return jnp.dot(x, params["fc2_w"].T, precision=hp) + params["fc2_b"]


if __name__ == "__main__":
    # Smallest spatial size compatible with the three valid convs is 36;
    # 40x40 yields the canonical 9x9 -> 3x3 -> 1x1 pyramid.
    B, C, H, W = 2, 4, 40, 40
    key = jax.random.PRNGKey(0)
    kx, kp = jax.random.split(key)
    x = jax.random.normal(kx, (B, C, H, W), jnp.float32)
    params = init_dqn_params(kp, C, H, W)
    packed = pack_params(params)

    fwd = jax.jit(make_dqn_forward(C, H, W, B))
    out = jax.block_until_ready(fwd(packed, x))
    ref = jax.block_until_ready(jax.jit(dqn_forward_ref)(params, x))

    assert out.shape == (B, NUM_ACTIONS)
    # bf16-stored weights/patches with f32 accumulation: loosened tolerance
    # vs. the full-f32 reference (structural bugs would show O(1) errors).
    np.testing.assert_allclose(np.asarray(out), np.asarray(ref),
                               rtol=5e-2, atol=5e-2)

    print("KERNEL_OK")
</pallas_src>

<mosaic_0001>
module attributes {stable_mosaic.version = 11 : i64} {
  func.func @_dqn_fused_kernel(%arg0: i32, %arg1: memref<288x256xbf16, #tpu.memory_space<vmem>>, %arg2: memref<256x32xbf16, #tpu.memory_space<vmem>>, %arg3: memref<1x32xf32, #tpu.memory_space<vmem>>, %arg4: memref<512x64xbf16, #tpu.memory_space<vmem>>, %arg5: memref<1x64xf32, #tpu.memory_space<vmem>>, %arg6: memref<576x64xbf16, #tpu.memory_space<vmem>>, %arg7: memref<1x64xf32, #tpu.memory_space<vmem>>, %arg8: memref<64x512xbf16, #tpu.memory_space<vmem>>, %arg9: memref<1x512xf32, #tpu.memory_space<vmem>>, %arg10: memref<512x256xbf16, #tpu.memory_space<vmem>>, %arg11: memref<1x256xf32, #tpu.memory_space<vmem>>, %arg12: memref<2x256xf32, #tpu.memory_space<vmem>>) attributes {dimension_semantics = [#tpu.dimension_semantics<arbitrary>], iteration_bounds = array<i64: 1>, scalar_prefetch = 0 : i64, scratch_operands = 0 : i64, tpu.core_type = #tpu.core_type<tc>, window_params = [{pipeline_mode = #tpu.pipeline_mode<synchronous>, transform_indices = @transform_0, window_bounds = array<i64: 288, 256>}, {pipeline_mode = #tpu.pipeline_mode<synchronous>, transform_indices = @transform_1, window_bounds = array<i64: 256, 32>}, {pipeline_mode = #tpu.pipeline_mode<synchronous>, transform_indices = @transform_2, window_bounds = array<i64: 1, 32>}, {pipeline_mode = #tpu.pipeline_mode<synchronous>, transform_indices = @transform_3, window_bounds = array<i64: 512, 64>}, {pipeline_mode = #tpu.pipeline_mode<synchronous>, transform_indices = @transform_4, window_bounds = array<i64: 1, 64>}, {pipeline_mode = #tpu.pipeline_mode<synchronous>, transform_indices = @transform_5, window_bounds = array<i64: 576, 64>}, {pipeline_mode = #tpu.pipeline_mode<synchronous>, transform_indices = @transform_6, window_bounds = array<i64: 1, 64>}, {pipeline_mode = #tpu.pipeline_mode<synchronous>, transform_indices = @transform_7, window_bounds = array<i64: 64, 512>}, {pipeline_mode = #tpu.pipeline_mode<synchronous>, transform_indices = @transform_8, window_bounds = array<i64: 1, 512>}, {pipeline_mode = #tpu.pipeline_mode<synchronous>, transform_indices = @transform_9, window_bounds = array<i64: 512, 256>}, {pipeline_mode = #tpu.pipeline_mode<synchronous>, transform_indices = @transform_10, window_bounds = array<i64: 1, 256>}, {pipeline_mode = #tpu.pipeline_mode<synchronous>, transform_indices = @transform_11, window_bounds = array<i64: 2, 256>}]} {
    %c0 = arith.constant 0 : index
    %c0_0 = arith.constant 0 : index
    %0 = vector.load %arg1[%c0, %c0_0] : memref<288x256xbf16, #tpu.memory_space<vmem>>, vector<288x256xbf16>
    %c0_1 = arith.constant 0 : index
    %c0_2 = arith.constant 0 : index
    %1 = vector.load %arg2[%c0_1, %c0_2] : memref<256x32xbf16, #tpu.memory_space<vmem>>, vector<256x32xbf16>
    %cst = arith.constant dense<0.000000e+00> : vector<288x32xf32>
    %2 = tpu.matmul %0, %1, %cst {dimension_numbers = #tpu.dot_dimension_numbers<[1], [0], [0], [1], [0, 0, 1, 1], [], []>} : vector<288x256xbf16>, vector<256x32xbf16>, vector<288x32xf32> -> vector<288x32xf32>
    %c0_3 = arith.constant 0 : index
    %c0_4 = arith.constant 0 : index
    %3 = vector.load %arg3[%c0_3, %c0_4] : memref<1x32xf32, #tpu.memory_space<vmem>>, vector<1x32xf32>
    %4 = vector.broadcast %3 : vector<1x32xf32> to vector<288x32xf32>
    %5 = arith.addf %2, %4 : vector<288x32xf32>
    %cst_5 = arith.constant 0.000000e+00 : f32
    %6 = vector.broadcast %cst_5 : f32 to vector<288x32xf32>
    %7 = arith.maximumf %5, %6 : vector<288x32xf32>
    %8 = vector.extract_strided_slice %7 {offsets = [0, 0], sizes = [18, 32], strides = [1, 1]} : vector<288x32xf32> to vector<18x32xf32>
    %9 = vector.extract_strided_slice %7 {offsets = [18, 0], sizes = [18, 32], strides = [1, 1]} : vector<288x32xf32> to vector<18x32xf32>
    %10 = vector.extract_strided_slice %7 {offsets = [36, 0], sizes = [18, 32], strides = [1, 1]} : vector<288x32xf32> to vector<18x32xf32>
    %11 = vector.extract_strided_slice %7 {offsets = [54, 0], sizes = [18, 32], strides = [1, 1]} : vector<288x32xf32> to vector<18x32xf32>
    %12 = vector.extract_strided_slice %7 {offsets = [72, 0], sizes = [18, 32], strides = [1, 1]} : vector<288x32xf32> to vector<18x32xf32>
    %13 = vector.extract_strided_slice %7 {offsets = [90, 0], sizes = [18, 32], strides = [1, 1]} : vector<288x32xf32> to vector<18x32xf32>
    %14 = vector.extract_strided_slice %7 {offsets = [108, 0], sizes = [18, 32], strides = [1, 1]} : vector<288x32xf32> to vector<18x32xf32>
    %15 = vector.extract_strided_slice %7 {offsets = [126, 0], sizes = [18, 32], strides = [1, 1]} : vector<288x32xf32> to vector<18x32xf32>
    %16 = vector.extract_strided_slice %7 {offsets = [144, 0], sizes = [18, 32], strides = [1, 1]} : vector<288x32xf32> to vector<18x32xf32>
    %17 = vector.extract_strided_slice %7 {offsets = [162, 0], sizes = [18, 32], strides = [1, 1]} : vector<288x32xf32> to vector<18x32xf32>
    %18 = vector.extract_strided_slice %7 {offsets = [180, 0], sizes = [18, 32], strides = [1, 1]} : vector<288x32xf32> to vector<18x32xf32>
    %19 = vector.extract_strided_slice %7 {offsets = [198, 0], sizes = [18, 32], strides = [1, 1]} : vector<288x32xf32> to vector<18x32xf32>
    %20 = vector.extract_strided_slice %7 {offsets = [216, 0], sizes = [18, 32], strides = [1, 1]} : vector<288x32xf32> to vector<18x32xf32>
    %21 = vector.extract_strided_slice %7 {offsets = [234, 0], sizes = [18, 32], strides = [1, 1]} : vector<288x32xf32> to vector<18x32xf32>
    %22 = vector.extract_strided_slice %7 {offsets = [252, 0], sizes = [18, 32], strides = [1, 1]} : vector<288x32xf32> to vector<18x32xf32>
    %23 = vector.extract_strided_slice %7 {offsets = [270, 0], sizes = [18, 32], strides = [1, 1]} : vector<288x32xf32> to vector<18x32xf32>
    %24 = tpu.concatenate %8, %9, %10, %11, %12, %13, %14, %15, %16, %17, %18, %19, %20, %21, %22, %23 in 1 : vector<18x32xf32>, vector<18x32xf32>, vector<18x32xf32>, vector<18x32xf32>, vector<18x32xf32>, vector<18x32xf32>, vector<18x32xf32>, vector<18x32xf32>, vector<18x32xf32>, vector<18x32xf32>, vector<18x32xf32>, vector<18x32xf32>, vector<18x32xf32>, vector<18x32xf32>, vector<18x32xf32>, vector<18x32xf32> -> vector<18x512xf32>
    %25 = arith.truncf %24 : vector<18x512xf32> to vector<18x512xbf16>
    %c0_6 = arith.constant 0 : index
    %c0_7 = arith.constant 0 : index
    %26 = vector.load %arg4[%c0_6, %c0_7] : memref<512x64xbf16, #tpu.memory_space<vmem>>, vector<512x64xbf16>
    %cst_8 = arith.constant dense<0.000000e+00> : vector<18x64xf32>
    %27 = tpu.matmul %25, %26, %cst_8 {dimension_numbers = #tpu.dot_dimension_numbers<[1], [0], [0], [1], [0, 0, 1, 1], [], []>} : vector<18x512xbf16>, vector<512x64xbf16>, vector<18x64xf32> -> vector<18x64xf32>
    %c0_9 = arith.constant 0 : index
    %c0_10 = arith.constant 0 : index
    %28 = vector.load %arg5[%c0_9, %c0_10] : memref<1x64xf32, #tpu.memory_space<vmem>>, vector<1x64xf32>
    %29 = vector.broadcast %28 : vector<1x64xf32> to vector<18x64xf32>
    %30 = arith.addf %27, %29 : vector<18x64xf32>
    %cst_11 = arith.constant 0.000000e+00 : f32
    %31 = vector.broadcast %cst_11 : f32 to vector<18x64xf32>
    %32 = arith.maximumf %30, %31 : vector<18x64xf32>
    %33 = vector.extract_strided_slice %32 {offsets = [0, 0], sizes = [2, 64], strides = [1, 1]} : vector<18x64xf32> to vector<2x64xf32>
    %34 = vector.extract_strided_slice %32 {offsets = [2, 0], sizes = [2, 64], strides = [1, 1]} : vector<18x64xf32> to vector<2x64xf32>
    %35 = vector.extract_strided_slice %32 {offsets = [4, 0], sizes = [2, 64], strides = [1, 1]} : vector<18x64xf32> to vector<2x64xf32>
    %36 = vector.extract_strided_slice %32 {offsets = [6, 0], sizes = [2, 64], strides = [1, 1]} : vector<18x64xf32> to vector<2x64xf32>
    %37 = vector.extract_strided_slice %32 {offsets = [8, 0], sizes = [2, 64], strides = [1, 1]} : vector<18x64xf32> to vector<2x64xf32>
    %38 = vector.extract_strided_slice %32 {offsets = [10, 0], sizes = [2, 64], strides = [1, 1]} : vector<18x64xf32> to vector<2x64xf32>
    %39 = vector.extract_strided_slice %32 {offsets = [12, 0], sizes = [2, 64], strides = [1, 1]} : vector<18x64xf32> to vector<2x64xf32>
    %40 = vector.extract_strided_slice %32 {offsets = [14, 0], sizes = [2, 64], strides = [1, 1]} : vector<18x64xf32> to vector<2x64xf32>
    %41 = vector.extract_strided_slice %32 {offsets = [16, 0], sizes = [2, 64], strides = [1, 1]} : vector<18x64xf32> to vector<2x64xf32>
    %42 = tpu.concatenate %33, %34, %35, %36, %37, %38, %39, %40, %41 in 1 : vector<2x64xf32>, vector<2x64xf32>, vector<2x64xf32>, vector<2x64xf32>, vector<2x64xf32>, vector<2x64xf32>, vector<2x64xf32>, vector<2x64xf32>, vector<2x64xf32> -> vector<2x576xf32>
    %43 = arith.truncf %42 : vector<2x576xf32> to vector<2x576xbf16>
    %c0_12 = arith.constant 0 : index
    %c0_13 = arith.constant 0 : index
    %44 = vector.load %arg6[%c0_12, %c0_13] : memref<576x64xbf16, #tpu.memory_space<vmem>>, vector<576x64xbf16>
    %cst_14 = arith.constant dense<0.000000e+00> : vector<2x64xf32>
    %45 = tpu.matmul %43, %44, %cst_14 {dimension_numbers = #tpu.dot_dimension_numbers<[1], [0], [0], [1], [0, 0, 1, 1], [], []>} : vector<2x576xbf16>, vector<576x64xbf16>, vector<2x64xf32> -> vector<2x64xf32>
    %c0_15 = arith.constant 0 : index
    %c0_16 = arith.constant 0 : index
    %46 = vector.load %arg7[%c0_15, %c0_16] : memref<1x64xf32, #tpu.memory_space<vmem>>, vector<1x64xf32>
    %47 = vector.broadcast %46 : vector<1x64xf32> to vector<2x64xf32>
    %48 = arith.addf %45, %47 : vector<2x64xf32>
    %cst_17 = arith.constant 0.000000e+00 : f32
    %49 = vector.broadcast %cst_17 : f32 to vector<2x64xf32>
    %50 = arith.maximumf %48, %49 : vector<2x64xf32>
    %51 = arith.truncf %50 : vector<2x64xf32> to vector<2x64xbf16>
    %c0_18 = arith.constant 0 : index
    %c0_19 = arith.constant 0 : index
    %52 = vector.load %arg8[%c0_18, %c0_19] : memref<64x512xbf16, #tpu.memory_space<vmem>>, vector<64x512xbf16>
    %cst_20 = arith.constant dense<0.000000e+00> : vector<2x512xf32>
    %53 = tpu.matmul %51, %52, %cst_20 {dimension_numbers = #tpu.dot_dimension_numbers<[1], [0], [0], [1], [0, 0, 1, 1], [], []>} : vector<2x64xbf16>, vector<64x512xbf16>, vector<2x512xf32> -> vector<2x512xf32>
    %c0_21 = arith.constant 0 : index
    %c0_22 = arith.constant 0 : index
    %54 = vector.load %arg9[%c0_21, %c0_22] : memref<1x512xf32, #tpu.memory_space<vmem>>, vector<1x512xf32>
    %55 = vector.broadcast %54 : vector<1x512xf32> to vector<2x512xf32>
    %56 = arith.addf %53, %55 : vector<2x512xf32>
    %cst_23 = arith.constant 0.000000e+00 : f32
    %57 = vector.broadcast %cst_23 : f32 to vector<2x512xf32>
    %58 = arith.maximumf %56, %57 : vector<2x512xf32>
    %59 = arith.truncf %58 : vector<2x512xf32> to vector<2x512xbf16>
    %c0_24 = arith.constant 0 : index
    %c0_25 = arith.constant 0 : index
    %60 = vector.load %arg10[%c0_24, %c0_25] : memref<512x256xbf16, #tpu.memory_space<vmem>>, vector<512x256xbf16>
    %cst_26 = arith.constant dense<0.000000e+00> : vector<2x256xf32>
    %61 = tpu.matmul %59, %60, %cst_26 {dimension_numbers = #tpu.dot_dimension_numbers<[1], [0], [0], [1], [0, 0, 1, 1], [], []>} : vector<2x512xbf16>, vector<512x256xbf16>, vector<2x256xf32> -> vector<2x256xf32>
    %c0_27 = arith.constant 0 : index
    %c0_28 = arith.constant 0 : index
    %62 = vector.load %arg11[%c0_27, %c0_28] : memref<1x256xf32, #tpu.memory_space<vmem>>, vector<1x256xf32>
    %63 = vector.broadcast %62 : vector<1x256xf32> to vector<2x256xf32>
    %64 = arith.addf %61, %63 : vector<2x256xf32>
    %c0_29 = arith.constant 0 : index
    %c0_30 = arith.constant 0 : index
    %65 = vector.load %arg12[%c0_29, %c0_30] : memref<2x256xf32, #tpu.memory_space<vmem>>, vector<2x256xf32>
    tpu.vector_store %arg12[%c0_29, %c0_30], %64 {strides = array<i32>} : memref<2x256xf32, #tpu.memory_space<vmem>>, vector<2x256xf32>,
    return
  }
  func.func @transform_0(%arg0: i32) -> (i32, i32) {
    %c0_i32 = arith.constant 0 : i32
    %c0_i32_0 = arith.constant 0 : i32
    %c0_i32_1 = arith.constant 0 : i32
    return %c0_i32, %c0_i32_0 : i32, i32
  }
  func.func @transform_1(%arg0: i32) -> (i32, i32) {
    %c0_i32 = arith.constant 0 : i32
    %c0_i32_0 = arith.constant 0 : i32
    %c0_i32_1 = arith.constant 0 : i32
    return %c0_i32, %c0_i32_0 : i32, i32
  }
  func.func @transform_2(%arg0: i32) -> (i32, i32) {
    %c0_i32 = arith.constant 0 : i32
    %c0_i32_0 = arith.constant 0 : i32
    %c0_i32_1 = arith.constant 0 : i32
    return %c0_i32, %c0_i32_0 : i32, i32
  }
  func.func @transform_3(%arg0: i32) -> (i32, i32) {
    %c0_i32 = arith.constant 0 : i32
    %c0_i32_0 = arith.constant 0 : i32
    %c0_i32_1 = arith.constant 0 : i32
    return %c0_i32, %c0_i32_0 : i32, i32
  }
  func.func @transform_4(%arg0: i32) -> (i32, i32) {
    %c0_i32 = arith.constant 0 : i32
    %c0_i32_0 = arith.constant 0 : i32
    %c0_i32_1 = arith.constant 0 : i32
    return %c0_i32, %c0_i32_0 : i32, i32
  }
  func.func @transform_5(%arg0: i32) -> (i32, i32) {
    %c0_i32 = arith.constant 0 : i32
    %c0_i32_0 = arith.constant 0 : i32
    %c0_i32_1 = arith.constant 0 : i32
    return %c0_i32, %c0_i32_0 : i32, i32
  }
  func.func @transform_6(%arg0: i32) -> (i32, i32) {
    %c0_i32 = arith.constant 0 : i32
    %c0_i32_0 = arith.constant 0 : i32
    %c0_i32_1 = arith.constant 0 : i32
    return %c0_i32, %c0_i32_0 : i32, i32
  }
  func.func @transform_7(%arg0: i32) -> (i32, i32) {
    %c0_i32 = arith.constant 0 : i32
    %c0_i32_0 = arith.constant 0 : i32
    %c0_i32_1 = arith.constant 0 : i32
    return %c0_i32, %c0_i32_0 : i32, i32
  }
  func.func @transform_8(%arg0: i32) -> (i32, i32) {
    %c0_i32 = arith.constant 0 : i32
    %c0_i32_0 = arith.constant 0 : i32
    %c0_i32_1 = arith.constant 0 : i32
    return %c0_i32, %c0_i32_0 : i32, i32
  }
  func.func @transform_9(%arg0: i32) -> (i32, i32) {
    %c0_i32 = arith.constant 0 : i32
    %c0_i32_0 = arith.constant 0 : i32
    %c0_i32_1 = arith.constant 0 : i32
    return %c0_i32, %c0_i32_0 : i32, i32
  }
  func.func @transform_10(%arg0: i32) -> (i32, i32) {
    %c0_i32 = arith.constant 0 : i32
    %c0_i32_0 = arith.constant 0 : i32
    %c0_i32_1 = arith.constant 0 : i32
    return %c0_i32, %c0_i32_0 : i32, i32
  }
  func.func @transform_11(%arg0: i32) -> (i32, i32) {
    %c0_i32 = arith.constant 0 : i32
    %c0_i32_0 = arith.constant 0 : i32
    %c0_i32_1 = arith.constant 0 : i32
    return %c0_i32, %c0_i32_0 : i32, i32
  }
}

</mosaic_0001>

<bundles_post_ra>
// kernel: forward.1
= control target key start
LH: loop header
LB: loop body
LE: loop exit
PB: predicated region body
PF: predicated region fallthrough
CT: control target
= control target key end

     0   :  { %v3089_v1 = vmov 0   ;;  %s3999_s0 = inlined_call_operand.vmem [shape: bf16[288,256], index: 0, kind: input, shape index: {}]   ;;  %s4000_s1 = inlined_call_operand.vmem [shape: bf16[256,32], index: 1, kind: input, shape index: {}]   ;;  %s4001_s2 = inlined_call_operand.vmem [shape: f32[1,32], index: 2, kind: input, shape index: {}]   ;;  %s4002_s3 = inlined_call_operand.vmem [shape: bf16[512,64], index: 3, kind: input, shape index: {}]   ;;  %s4003_s4 = inlined_call_operand.vmem [shape: f32[1,64], index: 4, kind: input, shape index: {}]   ;;  %s4004_s5 = inlined_call_operand.vmem [shape: bf16[576,64], index: 5, kind: input, shape index: {}]   ;;  %s4005_s6 = inlined_call_operand.vmem [shape: f32[1,64], index: 6, kind: input, shape index: {}]   ;;  %s4006_s7 = inlined_call_operand.vmem [shape: bf16[64,512], index: 7, kind: input, shape index: {}]   ;;  %s4007_s8 = inlined_call_operand.vmem [shape: f32[1,512], index: 8, kind: input, shape index: {}]   ;;  %s4008_s9 = inlined_call_operand.vmem [shape: bf16[512,256], index: 9, kind: input, shape index: {}]   ;;  %s4009_s10 = inlined_call_operand.vmem [shape: f32[1,256], index: 10, kind: input, shape index: {}]   ;;  %s4010_s11 = inlined_call_operand.hbm [shape: f32[2,256], index: 11, kind: output, shape index: {}]  }
   0x1   :  { %v2809_v0 = vld [vmem:[%s4000_s1 + $0x38] sm:$0xff]   ;;  %391 = vmatprep.subr.bf16.mxu0 %v3089_v1  ;;  %v2810_v2 = vld [vmem:[%s4000_s1 + $0x30] sm:$0xff]   ;;  %v2811_v3 = vld [vmem:[%s4000_s1 + $0x28] sm:$0xff]  }
   0x2   :  { %392 = vmatpush1.bf16.msra.mxu0 %v2809_v0  ;;  %v2812_v4 = vld [vmem:[%s4000_s1 + $0x20] sm:$0xff]   ;;  %v2813_v5 = vld [vmem:[%s4000_s1 + $0x18] sm:$0xff]   ;;  %v2814_v7 = vld [vmem:[%s4000_s1 + $0x10] sm:$0xff]  }
   0x3   :  { %393 = vmatprep.subr.bf16.mxu0 %v3089_v1  ;;  %v2827_v6 = vld [vmem:[%s3999_s0 + $0x4] ss:$8 sps:$4 sm:$0xff]   ;;  %v2817_v10 = vld [vmem:[%s4000_s1 + $0x78] sm:$0xff]   ;;  %v2818_v11 = vld [vmem:[%s4000_s1 + $0x70] sm:$0xff]  }
   0x4   :  { %423 = vmatprep.mubr.bf16.mxu0 %v2827_v6  ;;  %v2815_v8 = vld [vmem:[%s4000_s1 + $0x8] sm:$0xff]   ;;  %v2816_v9 = vld [vmem:[%s4000_s1] sm:$0xff]   ;;  %v2821_v14 = vld [vmem:[%s4000_s1 + $0x58] sm:$0xff]  }
   0x5   :  { %v2819_v12 = vld [vmem:[%s4000_s1 + $0x68] sm:$0xff]   ;;  %v2820_v13 = vld [vmem:[%s4000_s1 + $0x60] sm:$0xff]   ;;  %v2822_v15 = vld [vmem:[%s4000_s1 + $0x50] sm:$0xff]  }
   0x6   :  { %394 = vmatpush1.bf16.msra.mxu0 %v2810_v2  ;;  %v2823_v16 = vld [vmem:[%s4000_s1 + $0x48] sm:$0xff]   ;;  %v2824_v17 = vld [vmem:[%s4000_s1 + $0x40] sm:$0xff]   ;;  %v2828_v19 = vld [vmem:[%s3999_s0 + $0x14] ss:$8 sps:$4 sm:$0xff]  }
   0x7   :  { %395 = vmatprep.subr.bf16.mxu0 %v3089_v1  ;;  %v2825_v18 = vld [vmem:[%s3999_s0] ss:$8 sps:$4 sm:$0xff]   ;;  %v2830_v20 = vld [vmem:[%s3999_s0 + $0x10] ss:$8 sps:$4 sm:$0xff]   ;;  %v2831_v21 = vld [vmem:[%s3999_s0 + $0x24] ss:$8 sps:$4 sm:$0xff]  }
   0x8   :  { %v2833_v22 = vld [vmem:[%s3999_s0 + $0x20] ss:$8 sps:$4 sm:$0xff]   ;;  %v2834_v23 = vld [vmem:[%s3999_s0 + $0x34] ss:$8 sps:$4 sm:$0xff]   ;;  %v2836_v24 = vld [vmem:[%s3999_s0 + $0x30] ss:$8 sps:$4 sm:$0xff]  }
   0x9   :  { %v2837_v25 = vld [vmem:[%s3999_s0 + $0x44] ss:$8 sps:$4 sm:$0xff]   ;;  %v2839_v26 = vld [vmem:[%s3999_s0 + $0x40] ss:$8 sps:$4 sm:$0xff]   ;;  %v2840_v27 = vld [vmem:[%s3999_s0 + $0x54] ss:$8 sps:$4 sm:$0xff]  }
   0xa   :  { %396 = vmatpush1.bf16.msra.mxu0 %v2811_v3  ;;  %v2842_v28 = vld [vmem:[%s3999_s0 + $0x50] ss:$8 sps:$4 sm:$0xff]   ;;  %v2843_v29 = vld [vmem:[%s3999_s0 + $0x64] ss:$8 sps:$4 sm:$0xff]   ;;  %v2845_v30 = vld [vmem:[%s3999_s0 + $0x60] ss:$8 sps:$4 sm:$0xff]  }
   0xb   :  { %397 = vmatprep.subr.bf16.mxu0 %v3089_v1  ;;  %v2846_v31 = vld [vmem:[%s3999_s0 + $0x74] ss:$8 sps:$4 sm:$0xff]  }
   0xe   :  { %398 = vmatpush1.bf16.msra.mxu0 %v2812_v4 }
   0xf   :  { %399 = vmatprep.subr.bf16.mxu0 %v3089_v1 }
  0x12   :  { %400 = vmatpush1.bf16.msra.mxu0 %v2813_v5 }
  0x13   :  { %401 = vmatprep.subr.bf16.mxu0 %v3089_v1 }
  0x16   :  { %402 = vmatpush1.bf16.msra.mxu0 %v2814_v7 }
  0x17   :  { %403 = vmatprep.subr.bf16.mxu0 %v3089_v1 }
  0x1a   :  { %404 = vmatpush1.bf16.msra.mxu0 %v2815_v8 }
  0x1b   :  { %405 = vmatprep.subr.bf16.mxu0 %v3089_v1 }
  0x1e   :  { %406 = vmatpush1.bf16.msra.mxu0 %v2816_v9 }
  0x1f   :  { %407 = vmatprep.subr.bf16.mxu0 %v3089_v1 }
  0x22   :  { %408 = vmatpush2.bf16.msra.mxu0 %v2817_v10 }
  0x23   :  { %409 = vmatprep.subr.bf16.mxu0 %v3089_v1 }
  0x26   :  { %410 = vmatpush2.bf16.msra.mxu0 %v2818_v11 }
  0x27   :  { %411 = vmatprep.subr.bf16.mxu0 %v3089_v1 }
  0x2a   :  { %412 = vmatpush2.bf16.msra.mxu0 %v2819_v12 }
  0x2b   :  { %413 = vmatprep.subr.bf16.mxu0 %v3089_v1 }
  0x2e   :  { %414 = vmatpush2.bf16.msra.mxu0 %v2820_v13 }
  0x2f   :  { %415 = vmatprep.subr.bf16.mxu0 %v3089_v1 }
  0x32   :  { %416 = vmatpush2.bf16.msra.mxu0 %v2821_v14 }
  0x33   :  { %417 = vmatprep.subr.bf16.mxu0 %v3089_v1 }
  0x36   :  { %418 = vmatpush2.bf16.msra.mxu0 %v2822_v15 }
  0x37   :  { %419 = vmatprep.subr.bf16.mxu0 %v3089_v1 }
  0x3a   :  { %420 = vmatpush2.bf16.msra.mxu0 %v2823_v16 }
  0x3b   :  { %421 = vmatprep.subr.bf16.mxu0 %v3089_v1 }
  0x3e   :  { %422 = vmatpush2.bf16.msra.mxu0 %v2824_v17 }
  0x41   :  { %424 = vmatmul.mubr.bf16.vlgmr.msra.gmra.mxu0 %v2825_v18 }
  0x42   :  { %431 = vmatprep.mubr.bf16.mxu0 %v2828_v19 }
  0x49   :  { %432 = vmatmul.mubr.bf16.gmra.mxu0 %v2830_v20 }
  0x4a   :  { %439 = vmatprep.mubr.bf16.mxu0 %v2831_v21 }
  0x51   :  { %440 = vmatmul.mubr.bf16.gmra.mxu0 %v2833_v22 }
  0x52   :  { %447 = vmatprep.mubr.bf16.mxu0 %v2834_v23 }
  0x59   :  { %448 = vmatmul.mubr.bf16.gmra.mxu0 %v2836_v24 }
  0x5a   :  { %455 = vmatprep.mubr.bf16.mxu0 %v2837_v25 }
  0x61   :  { %456 = vmatmul.mubr.bf16.gmra.mxu0 %v2839_v26 }
  0x62   :  { %463 = vmatprep.mubr.bf16.mxu0 %v2840_v27 }
  0x69   :  { %464 = vmatmul.mubr.bf16.gmra.mxu0 %v2842_v28 }
  0x6a   :  { %471 = vmatprep.mubr.bf16.mxu0 %v2843_v29 }
  0x6b   :  { %16 = vsyncpa [#allocation3], 0  ;;  %v2848_v32 = vld [vmem:[%s3999_s0 + $0x70] ss:$8 sps:$4 sm:$0xff]   ;;  %v2849_v33 = vld [vmem:[%s3999_s0 + $0x84] ss:$8 sps:$4 sm:$0xff]  }
  0x6c   :  { %v2851_v34 = vld [vmem:[%s3999_s0 + $0x80] ss:$8 sps:$4 sm:$0xff]   ;;  %v2852_v35 = vld [vmem:[%s3999_s0 + $0x94] ss:$8 sps:$4 sm:$0xff]   ;;  %v2854_v36 = vld [vmem:[%s3999_s0 + $0x90] ss:$8 sps:$4 sm:$0xff]  }
  0x6d   :  { %v2855_v37 = vld [vmem:[%s3999_s0 + $0xa4] ss:$8 sps:$4 sm:$0xff]   ;;  %v2857_v38 = vld [vmem:[%s3999_s0 + $0xa0] ss:$8 sps:$4 sm:$0xff]   ;;  %v2858_v39 = vld [vmem:[%s3999_s0 + $0xb4] ss:$8 sps:$4 sm:$0xff]  }
  0x6e   :  { %v2860_v40 = vld [vmem:[%s3999_s0 + $0xb0] ss:$8 sps:$4 sm:$0xff]   ;;  %v2861_v41 = vld [vmem:[%s3999_s0 + $0xc4] ss:$8 sps:$4 sm:$0xff]   ;;  %v2863_v42 = vld [vmem:[%s3999_s0 + $0xc0] ss:$8 sps:$4 sm:$0xff]  }
  0x6f   :  { %v2864_v43 = vld [vmem:[%s3999_s0 + $0xd4] ss:$8 sps:$4 sm:$0xff]   ;;  %v2866_v44 = vld [vmem:[%s3999_s0 + $0xd0] ss:$8 sps:$4 sm:$0xff]   ;;  %v2867_v45 = vld [vmem:[%s3999_s0 + $0xe4] ss:$8 sps:$4 sm:$0xff]  }
  0x70   :  { %v2869_v46 = vld [vmem:[%s3999_s0 + $0xe0] ss:$8 sps:$4 sm:$0xff]   ;;  %v2870_v47 = vld [vmem:[%s3999_s0 + $0xf4] ss:$8 sps:$4 sm:$0xff]   ;;  %v2872_v48 = vld [vmem:[%s3999_s0 + $0xf0] ss:$8 sps:$4 sm:$0xff]  }
  0x71   :  { %472 = vmatmul.mubr.bf16.gmra.mxu0 %v2845_v30  ;;  %v2873_v49 = vld [vmem:[%s3999_s0 + $0x104] ss:$8 sps:$4 sm:$0xff]   ;;  %v2875_v50 = vld [vmem:[%s3999_s0 + $0x100] ss:$8 sps:$4 sm:$0xff]   ;;  %v2876_v51 = vld [vmem:[%s3999_s0 + $0x114] ss:$8 sps:$4 sm:$0xff]  }
  0x72   :  { %479 = vmatprep.mubr.bf16.mxu0 %v2846_v31  ;;  %v2878_v52 = vld [vmem:[%s3999_s0 + $0x110] ss:$8 sps:$4 sm:$0xff]   ;;  %v3335_v59 = vld [vmem:[%s4001_s2] ss:$0 sm:$0xff]  ;;  %vm607_vm0 = vcmask 1045504   ;;  %s3090_s0 = smov 32  }
  0x73   :  { %vm624_vm1 = vcmask 1043456   ;;  %v2879_v26 = vld [vmem:[%s4002_s3 + $0x78] sm:$0xff]   ;;  %v2881_v28 = vld [vmem:[%s4002_s3 + $0x70] sm:$0xff]   ;;  %s3091_s12 = smov 64   ;;  %vm641_vm2 = vcmask 1041408   ;;  %s3092_s17 = smov 96  }
  0x74   :  { %v2880_v27 = vld [vmem:[%s4002_s3 + $0x38] sm:$0xff]   ;;  %2585 = vmatprep.subr.bf16.mxu1 %v2879_v26  ;;  %vm803_vm3 = vcmask 261120   ;;  %vm807_vm4 = vcmask 523264   ;;  %vm811_vm5 = vcmask 785408   ;;  %vm3094_vm6 = vmmov 0  }
  0x75   :  { %2586 = vmatpush3.bf16.msra.mxu1 %v2880_v27 }
  0x76   :  { %2587 = vmatprep.subr.bf16.mxu1 %v2881_v28 }
  0x79   :  { %480 = vmatmul.mubr.bf16.gmra.mxu0 %v2848_v32 }
  0x7a   :  { %487 = vmatprep.mubr.bf16.mxu0 %v2849_v33  ;;  %v2882_v33 = vld [vmem:[%s4002_s3 + $0x30] sm:$0xff]  }
  0x7b   :  { %2588 = vmatpush3.bf16.msra.mxu1 %v2882_v33 }
  0x81   :  { %488 = vmatmul.mubr.bf16.gmra.mxu0 %v2851_v34 }
  0x82   :  { %495 = vmatprep.mubr.bf16.mxu0 %v2852_v35  ;;  %v2883_v35 = vld [vmem:[%s4002_s3 + $0x68] sm:$0xff]  }
  0x83   :  { %2589 = vmatprep.subr.bf16.mxu1 %v2883_v35 }
  0x89   :  { %496 = vmatmul.mubr.bf16.gmra.mxu0 %v2854_v36 }
  0x8a   :  { %503 = vmatprep.mubr.bf16.mxu0 %v2855_v37  ;;  %v2884_v37 = vld [vmem:[%s4002_s3 + $0x28] sm:$0xff]  }
  0x8b   :  { %2590 = vmatpush3.bf16.msra.mxu1 %v2884_v37 }
  0x91   :  { %504 = vmatmul.mubr.bf16.gmra.mxu0 %v2857_v38 }
  0x92   :  { %511 = vmatprep.mubr.bf16.mxu0 %v2858_v39 }
  0x99   :  { %512 = vmatmul.mubr.bf16.gmra.mxu0 %v2860_v40 }
  0x9a   :  { %519 = vmatprep.mubr.bf16.mxu0 %v2861_v41 }
  0xa1   :  { %520 = vmatmul.mubr.bf16.gmra.mxu0 %v2863_v42 }
  0xa2   :  { %527 = vmatprep.mubr.bf16.mxu0 %v2864_v43 }
  0xa9   :  { %528 = vmatmul.mubr.bf16.gmra.mxu0 %v2866_v44 }
  0xaa   :  { %535 = vmatprep.mubr.bf16.mxu0 %v2867_v45 }
  0xb1   :  { %536 = vmatmul.mubr.bf16.gmra.mxu0 %v2869_v46  ;;  %v2885_v46 = vld [vmem:[%s4002_s3 + $0x60] sm:$0xff]  }
  0xb2   :  { %543 = vmatprep.mubr.bf16.mxu0 %v2870_v47  ;;  %v2886_v47 = vld [vmem:[%s4002_s3 + $0x20] sm:$0xff]   ;;  %2591 = vmatprep.subr.bf16.mxu1 %v2885_v46 }
  0xb3   :  { %2592 = vmatpush3.bf16.msra.mxu1 %v2886_v47 }
  0xb9   :  { %544 = vmatmul.mubr.bf16.gmra.mxu0 %v2872_v48  ;;  %v2887_v48 = vld [vmem:[%s4002_s3 + $0x58] sm:$0xff]  }
  0xba   :  { %551 = vmatprep.mubr.bf16.mxu0 %v2873_v49  ;;  %2593 = vmatprep.subr.bf16.mxu1 %v2887_v48 }
  0xc1   :  { %552 = vmatmul.mubr.bf16.gmra.mxu0 %v2875_v50 }
  0xc2   :  { %559 = vmatprep.mubr.bf16.mxu0 %v2876_v51 }
  0xc9   :  { %560 = vmatmul.mubr.bf16.gmra.mxu0 %v2878_v52  ;;  %v2888_v52 = vld [vmem:[%s4002_s3 + $0x18] sm:$0xff]  }
  0xca   :  { %2594 = vmatpush3.bf16.msra.mxu1 %v2888_v52 }
 0x101   :  { %v3328_v53 = vpop.f32.mrf.mxu0 }
 0x103   :  { %v427_v54 = vpop.f32.mrf.mxu0 }
 0x105   :  { %v3330_v55 = vpop.f32.mrf.mxu0 }
 0x107   :  { %v430_v56 = vpop.f32.mrf.mxu0 }
 0x109   :  { %v433_v57 = vpop.f32.mrf.mxu0 }
 0x10a   :  { %v3338_v61 = vadd.f32 %v3335_v59, %v433_v57 }
 0x10b   :  { %v435_v58 = vpop.f32.mrf.mxu0 }
 0x10c   :  { %v570_v3 = vmax.f32 %v3338_v61, 0.0  ;;  %v2899_v61 = vld [vmem:[%s4002_s3 + $0xe8] sm:$0xff]  }
 0x10d   :  { %v436_v60 = vpop.f32.mrf.mxu0 }
 0x10e   :  { %v437_v62 = vadd.f32 %v3335_v59, %v436_v60  ;;  %v608_v9 = vrot.slane %v570_v3, 2 }
 0x10f   :  { %v438_v63 = vpop.f32.mrf.mxu0 }
 0x110   :  { %v571_v0 = vmax.f32 %v437_v62, 0.0 }
 0x111   :  { %v441_v2 = vpop.f32.mrf.mxu0 }
 0x112   :  { %v442_v4 = vadd.f32 %v3335_v59, %v441_v2  ;;  %v609_v6 = vrot.slane %v571_v0, 2 }
 0x113   :  { %v443_v5 = vpop.f32.mrf.mxu0 }
 0x114   :  { %v572_v7 = vmax.f32 %v442_v4, 0.0  ;;  %v610_v14 = vsel %vm607_vm0, %v608_v9, %v609_v6  ;;  %v2889_v5 = vld [vmem:[%s4002_s3 + $0x50] sm:$0xff]  }
 0x115   :  { %v444_v8 = vpop.f32.mrf.mxu0  ;;  %2595 = vmatprep.subr.bf16.mxu1 %v2889_v5 }
 0x116   :  { %v3345_v10 = vrot.slane %v572_v7, 2  ;;  %v445_v11 = vadd.f32 %v3335_v59, %v444_v8  ;;  %v625_v23 = vrot.slane %v572_v7, 4 }
 0x117   :  { %v446_v12 = vpop.f32.mrf.mxu0 }
 0x118   :  { %v573_v13 = vmax.f32 %v445_v11, 0.0  ;;  %v612_v15 = vsel %vm607_vm0, %v609_v6, %v3345_v10  ;;  %v2890_v6 = vld [vmem:[%s4002_s3 + $0x10] sm:$0xff]  }
 0x119   :  { %v449_v16 = vpop.f32.mrf.mxu0  ;;  %v2709_v17 = vpack.i.bf16 %v612_v15, %v610_v14  ;;  %2596 = vmatpush3.bf16.msra.mxu1 %v2890_v6 }
 0x11a   :  { %v3352_v18 = vadd.f32 %v3335_v59, %v449_v16  ;;  %v626_v20 = vrot.slane %v573_v13, 4 }
 0x11b   :  { %v451_v19 = vpop.f32.mrf.mxu0  ;;  %2710 = vrot.lane.b32.xlu0 %v2709_v17, %s3090_s0  ;;  %v2891_v17 = vld [vmem:[%s4002_s3 + $0x48] sm:$0xff]  }
 0x11c   :  { %v574_v21 = vmax.f32 %v3352_v18, 0.0  ;;  %v627_v29 = vsel %vm624_vm1, %v625_v23, %v626_v20  ;;  %v2892_v19 = vld [vmem:[%s4002_s3 + $0x8] sm:$0xff]   ;;  %2597 = vmatprep.subr.bf16.mxu1 %v2891_v17 }
 0x11d   :  { %v452_v22 = vpop.f32.mrf.mxu0  ;;  %2598 = vmatpush3.bf16.msra.mxu1 %v2892_v19 }
 0x11e   :  { %v3358_v24 = vrot.slane %v574_v21, 4  ;;  %v453_v8 = vadd.f32 %v3335_v59, %v452_v22 }
 0x11f   :  { %v454_v25 = vpop.f32.mrf.mxu0 }
 0x120   :  { %v629_v30 = vsel %vm624_vm1, %v626_v20, %v3358_v24  ;;  %v575_v22 = vmax.f32 %v453_v8, 0.0 }
 0x121   :  { %v457_v31 = vpop.f32.mrf.mxu0  ;;  %v2714_v32 = vpack.i.bf16 %v629_v30, %v627_v29 }
 0x122   :  { %v458_v63 = vadd.f32 %v3335_v59, %v457_v31  ;;  %v2893_v31 = vld [vmem:[%s4002_s3 + $0x40] sm:$0xff]  }
 0x123   :  { %v459_v34 = vpop.f32.mrf.mxu0  ;;  %2715 = vrot.lane.b32.xlu1 %v2714_v32, %s3091_s12  ;;  %v2894_v32 = vld [vmem:[%s4002_s3] sm:$0xff]   ;;  %2599 = vmatprep.subr.bf16.mxu1 %v2893_v31 }
 0x124   :  { %v576_v15 = vmax.f32 %v458_v63, 0.0  ;;  %v643_v34 = vrot.slane %v575_v22, 6  ;;  %2600 = vmatpush3.bf16.msra.mxu1 %v2894_v32 }
 0x125   :  { %v3379_v36 = vpop.f32.mrf.mxu0 }
 0x126   :  { %v645_v27 = vrot.slane %v576_v15, 6 }
 0x127   :  { %v462_v38 = vpop.f32.mrf.mxu0 }
 0x129   :  { %v3384_v39 = vpop.f32.mrf.mxu0 }
 0x12b   :  { %v467_v40 = vpop.f32.mrf.mxu0 }
 0x12d   :  { %v468_v41 = vpop.f32.mrf.mxu0 }
 0x12e   :  { %v3387_v44 = vadd.f32 %v3335_v59, %v468_v41 }
 0x12f   :  { %v470_v42 = vpop.f32.mrf.mxu0 }
 0x130   :  { %v579_v54 = vmax.f32 %v3387_v44, 0.0  ;;  %v642_v42 = vrot.slane %v574_v21, 6 }
 0x131   :  { %v473_v43 = vpop.f32.mrf.mxu0 }
 0x132   :  { %v474_v45 = vadd.f32 %v3335_v59, %v473_v43  ;;  %v659_v0 = vrot.slane %v579_v54, 2 }
 0x133   :  { %v475_v49 = vpop.f32.mrf.mxu0 }
 0x134   :  { %v580_v50 = vmax.f32 %v474_v45, 0.0  ;;  %v646_v45 = vsel %vm641_vm2, %v643_v34, %v645_v27  ;;  %v644_v49 = vsel %vm641_vm2, %v642_v42, %v643_v34 }
 0x135   :  { %v476_v51 = vpop.f32.mrf.mxu0 }
 0x136   :  { %v477_v56 = vadd.f32 %v3335_v59, %v476_v51  ;;  %v660_v58 = vrot.slane %v580_v50, 2  ;;  %v2734_v51 = vpack.i.bf16 %v646_v45, %v644_v49 }
 0x137   :  { %v478_v57 = vpop.f32.mrf.mxu0 }
 0x138   :  { %v581_v60 = vmax.f32 %v477_v56, 0.0  ;;  %v661_v11 = vsel %vm607_vm0, %v659_v0, %v660_v58 }
 0x139   :  { %v481_v62 = vpop.f32.mrf.mxu0 }
 0x13a   :  { %v3407_v2 = vrot.slane %v581_v60, 2  ;;  %v482_v4 = vadd.f32 %v3335_v59, %v481_v62  ;;  %v675_v28 = vrot.slane %v581_v60, 4 }
 0x13b   :  { %v483_v7 = vpop.f32.mrf.mxu0 }
 0x13c   :  { %v582_v9 = vmax.f32 %v482_v4, 0.0  ;;  %v663_v12 = vsel %vm607_vm0, %v660_v58, %v3407_v2  ;;  %v2739_v4 = vpack.i.bf16 %v3345_v10, %v3407_v2 }
 0x13d   :  { %v484_v13 = vpop.f32.mrf.mxu0  ;;  %v2719_v14 = vpack.i.bf16 %v663_v12, %v661_v11 }
 0x13e   :  { %v485_v16 = vadd.f32 %v3335_v59, %v484_v13  ;;  %v676_v23 = vrot.slane %v582_v9, 4 }
 0x13f   :  { %v486_v20 = vpop.f32.mrf.mxu0  ;;  %2720 = vrot.lane.b32.xlu0 %v2719_v14, %s3090_s0 }
 0x140   :  { %v583_v25 = vmax.f32 %v485_v16, 0.0  ;;  %v677_v37 = vsel %vm624_vm1, %v675_v28, %v676_v23 }
 0x141   :  { %v489_v26 = vpop.f32.mrf.mxu0 }
 0x142   :  { %v678_v29 = vrot.slane %v583_v25, 4  ;;  %v490_v30 = vadd.f32 %v3335_v59, %v489_v26  ;;  %v691_v52 = vrot.slane %v583_v25, 6 }
 0x143   :  { %v491_v33 = vpop.f32.mrf.mxu0 }
 0x144   :  { %v584_v35 = vmax.f32 %v490_v30, 0.0  ;;  %v679_v38 = vsel %vm624_vm1, %v676_v23, %v678_v29  ;;  %v2744_v60 = vpack.i.bf16 %v3358_v24, %v678_v29 }
 0x145   :  { %v492_v40 = vpop.f32.mrf.mxu0  ;;  %v2724_v41 = vpack.i.bf16 %v679_v38, %v677_v37 }
 0x146   :  { %v493_v43 = vadd.f32 %v3335_v59, %v492_v40  ;;  %v692_v47 = vrot.slane %v584_v35, 6 }
 0x147   :  { %v494_v46 = vpop.f32.mrf.mxu0  ;;  %2725 = vrot.lane.b32.xlu1 %v2724_v41, %s3091_s12 }
 0x148   :  { %v585_v48 = vmax.f32 %v493_v43, 0.0  ;;  %v693_v18 = vsel %vm641_vm2, %v691_v52, %v692_v47  ;;  %v2895_v46 = vld [vmem:[%s4002_s3 + $0xf8] sm:$0xff]  }
 0x149   :  { %v3443_v50 = vpop.f32.mrf.mxu0  ;;  %2613 = vmatprep.subr.bf16.mxu1 %v2895_v46 }
 0x14a   :  { %v694_v56 = vrot.slane %v585_v48, 6 }
 0x14b   :  { %v499_v57 = vpop.f32.mrf.mxu0  ;;  %2735 = vrot.lane.b32.xlu1 %v2734_v51, %s3092_s17 }
 0x14c   :  { %v695_v21 = vsel %vm641_vm2, %v692_v47, %v694_v56  ;;  %v2749_v6 = vpack.i.bf16 %v645_v27, %v694_v56 }
 0x14d   :  { %v3448_v58 = vpop.f32.mrf.mxu0  ;;  %v2729_v62 = vpack.i.bf16 %v695_v21, %v693_v18 }
 0x14f   :  { %v502_v63 = vpop.f32.mrf.mxu0  ;;  %2745 = vrot.lane.b32.xlu1 %v2744_v60, %s3091_s12  ;;  %2730 = vrot.lane.b32.xlu0 %v2729_v62, %s3092_s17 }
 0x151   :  { %v505_v0 = vpop.f32.mrf.mxu0 }
 0x152   :  { %v3457_v8 = vadd.f32 %v3335_v59, %v505_v0 }
 0x153   :  { %v507_v5 = vpop.f32.mrf.mxu0  ;;  %2740 = vrot.lane.b32.xlu0 %v2739_v4, %s3090_s0 }
 0x154   :  { %v588_v13 = vmax.f32 %v3457_v8, 0.0 }
 0x155   :  { %v508_v7 = vpop.f32.mrf.mxu0 }
 0x156   :  { %v509_v24 = vadd.f32 %v3335_v59, %v508_v7  ;;  %v708_v17 = vrot.slane %v588_v13, 2 }
 0x157   :  { %v510_v9 = vpop.f32.mrf.mxu0  ;;  %2750 = vrot.lane.b32.xlu0 %v2749_v6, %s3092_s17 }
 0x158   :  { %v589_v11 = vmax.f32 %v509_v24, 0.0 }
 0x159   :  { %v513_v12 = vpop.f32.mrf.mxu0 }
 0x15a   :  { %v514_v14 = vadd.f32 %v3335_v59, %v513_v12  ;;  %v709_v2 = vrot.slane %v589_v11, 2 }
 0x15b   :  { %v515_v10 = vpop.f32.mrf.mxu0 }
 0x15c   :  { %v590_v15 = vmax.f32 %v514_v14, 0.0  ;;  %v710_v25 = vsel %vm607_vm0, %v708_v17, %v709_v2 }
 0x15d   :  { %v516_v16 = vpop.f32.mrf.mxu0 }
 0x15e   :  { %v3465_v19 = vrot.slane %v590_v15, 2  ;;  %v517_v20 = vadd.f32 %v3335_v59, %v516_v16  ;;  %v724_v34 = vrot.slane %v590_v15, 4 }
 0x15f   :  { %v518_v22 = vpop.f32.mrf.mxu0 }
 0x160   :  { %v591_v23 = vmax.f32 %v517_v20, 0.0  ;;  %v712_v26 = vsel %vm607_vm0, %v709_v2, %v3465_v19 }
 0x161   :  { %v521_v27 = vpop.f32.mrf.mxu0  ;;  %v2754_v28 = vpack.i.bf16 %v712_v26, %v710_v25 }
 0x162   :  { %v522_v29 = vadd.f32 %v3335_v59, %v521_v27  ;;  %v725_v31 = vrot.slane %v591_v23, 4 }
 0x163   :  { %v523_v30 = vpop.f32.mrf.mxu0  ;;  %2755 = vrot.lane.b32.xlu0 %v2754_v28, %s3090_s0 }
 0x164   :  { %v592_v32 = vmax.f32 %v522_v29, 0.0  ;;  %v726_v41 = vsel %vm624_vm1, %v724_v34, %v725_v31 }
 0x165   :  { %v524_v33 = vpop.f32.mrf.mxu0 }
 0x166   :  { %v3473_v35 = vrot.slane %v592_v32, 4  ;;  %v525_v37 = vadd.f32 %v3335_v59, %v524_v33  ;;  %v740_v56 = vrot.slane %v592_v32, 6 }
 0x167   :  { %v526_v38 = vpop.f32.mrf.mxu0 }
 0x168   :  { %v593_v40 = vmax.f32 %v525_v37, 0.0  ;;  %v728_v42 = vsel %vm624_vm1, %v725_v31, %v3473_v35 }
 0x169   :  { %v529_v43 = vpop.f32.mrf.mxu0  ;;  %v2759_v45 = vpack.i.bf16 %v728_v42, %v726_v41 }
 0x16a   :  { %v530_v47 = vadd.f32 %v3335_v59, %v529_v43  ;;  %v741_v49 = vrot.slane %v593_v40, 6 }
 0x16b   :  { %v531_v48 = vpop.f32.mrf.mxu0  ;;  %2760 = vrot.lane.b32.xlu0 %v2759_v45, %s3091_s12 }
 0x16c   :  { %v594_v51 = vmax.f32 %v530_v47, 0.0  ;;  %v742_v21 = vsel %vm641_vm2, %v740_v56, %v741_v49 }
 0x16d   :  { %v3484_v52 = vpop.f32.mrf.mxu0 }
 0x16e   :  { %v743_v57 = vrot.slane %v594_v51, 6 }
 0x16f   :  { %v534_v18 = vpop.f32.mrf.mxu0 }
 0x170   :  { %v744_v60 = vsel %vm641_vm2, %v741_v49, %v743_v57 }
 0x171   :  { %v3488_v62 = vpop.f32.mrf.mxu0  ;;  %v2779_v63 = vpack.i.bf16 %v744_v60, %v742_v21 }
 0x173   :  { %v539_v0 = vpop.f32.mrf.mxu0  ;;  %2780 = vrot.lane.b32.xlu0 %v2779_v63, %s3092_s17 }
 0x175   :  { %v540_v4 = vpop.f32.mrf.mxu0 }
 0x176   :  { %v3492_v7 = vadd.f32 %v3335_v59, %v540_v4 }
 0x177   :  { %v542_v5 = vpop.f32.mrf.mxu0 }
 0x178   :  { %v597_v14 = vmax.f32 %v3492_v7, 0.0  ;;  %v2911_v7 = vld [vmem:[%s4004_s5 + $0x78] sm:$0xff]  }
 0x179   :  { %v545_v6 = vpop.f32.mrf.mxu0 }
 0x17a   :  { %v546_v24 = vadd.f32 %v3335_v59, %v545_v6  ;;  %v757_v20 = vrot.slane %v597_v14, 2 }
 0x17b   :  { %v547_v9 = vpop.f32.mrf.mxu0 }
 0x17c   :  { %v598_v11 = vmax.f32 %v546_v24, 0.0 }
 0x17d   :  { %v548_v12 = vpop.f32.mrf.mxu0 }
 0x17e   :  { %v549_v10 = vadd.f32 %v3335_v59, %v548_v12  ;;  %v758_v15 = vrot.slane %v598_v11, 2  ;;  %v426_v11 = vadd.f32 %v3335_v59, %v3328_v53  ;;  %v429_v12 = vadd.f32 %v3335_v59, %v3330_v55 }
 0x17f   :  { %v550_v2 = vpop.f32.mrf.mxu0 }
 0x180   :  { %v599_v16 = vmax.f32 %v549_v10, 0.0  ;;  %v759_v27 = vsel %vm607_vm0, %v757_v20, %v758_v15 }
 0x181   :  { %v553_v17 = vpop.f32.mrf.mxu0 }
 0x182   :  { %v760_v22 = vrot.slane %v599_v16, 2  ;;  %v554_v23 = vadd.f32 %v3335_v59, %v553_v17  ;;  %v773_v38 = vrot.slane %v599_v16, 4  ;;  %v568_v16 = vmax.f32 %v426_v11, 0.0 }
 0x183   :  { %v555_v25 = vpop.f32.mrf.mxu0  ;;  %v569_v17 = vmax.f32 %v429_v12, 0.0 }
 0x184   :  { %v600_v26 = vmax.f32 %v554_v23, 0.0  ;;  %v761_v28 = vsel %vm607_vm0, %v758_v15, %v760_v22  ;;  %v2784_v5 = vpack.i.bf16 %v3465_v19, %v760_v22  ;;  %v466_v23 = vadd.f32 %v3335_v59, %v3384_v39 }
 0x185   :  { %v556_v29 = vpop.f32.mrf.mxu0  ;;  %v2764_v30 = vpack.i.bf16 %v761_v28, %v759_v27 }
 0x186   :  { %v557_v31 = vadd.f32 %v3335_v59, %v556_v29  ;;  %v774_v33 = vrot.slane %v600_v26, 4 }
 0x187   :  { %v558_v32 = vpop.f32.mrf.mxu0  ;;  %2765 = vrot.lane.b32.xlu1 %v2764_v30, %s3090_s0 }
 0x188   :  { %v601_v34 = vmax.f32 %v557_v31, 0.0  ;;  %v775_v46 = vsel %vm624_vm1, %v773_v38, %v774_v33 }
 0x189   :  { %v561_v37 = vpop.f32.mrf.mxu0 }
 0x18a   :  { %v776_v40 = vrot.slane %v601_v34, 4  ;;  %v562_v41 = vadd.f32 %v3335_v59, %v561_v37  ;;  %v789_v60 = vrot.slane %v601_v34, 6  ;;  %v578_v34 = vmax.f32 %v466_v23, 0.0  ;;  %v2906_v23 = vld [vmem:[%s4002_s3 + $0x90] sm:$0xff]  }
 0x18b   :  { %v563_v42 = vpop.f32.mrf.mxu0 }
 0x18c   :  { %v602_v43 = vmax.f32 %v562_v41, 0.0  ;;  %v2789_v45 = vpack.i.bf16 %v3473_v35, %v776_v40  ;;  %v777_v47 = vsel %vm624_vm1, %v774_v33, %v776_v40 }
 0x18d   :  { %v564_v48 = vpop.f32.mrf.mxu0  ;;  %v2769_v49 = vpack.i.bf16 %v777_v47, %v775_v46  ;;  %v2711_v9 = vpop.permute.xlu0 %2710 }
 0x18e   :  { %v565_v51 = vadd.f32 %v3335_v59, %v564_v48  ;;  %2790 = vrot.lane.b32.xlu0 %v2789_v45, %s3091_s12  ;;  %v790_v18 = vrot.slane %v602_v43, 6  ;;  %v2713_v10 = vunpack.i.h.bf16 %v2711_v9  ;;  %v2712_v2 = vunpack.i.l.bf16 %v2711_v9  ;;  %v2898_v9 = vld [vmem:[%s4002_s3 + $0xb0] sm:$0xff]  }
 0x18f   :  { %v566_v56 = vpop.f32.mrf.mxu0  ;;  %2770 = vrot.lane.b32.xlu1 %v2769_v49, %s3091_s12 }
 0x190   :  { %v603_v21 = vmax.f32 %v565_v51, 0.0  ;;  %v791_v0 = vsel %vm641_vm2, %v789_v60, %v790_v18  ;;  %v804_v53 = vsel %vm803_vm3, %v568_v16, %v2712_v2  ;;  %v805_v55 = vsel %vm803_vm3, %v569_v17, %v2713_v10  ;;  %v2900_v16 = vld [vmem:[%s4002_s3 + $0xa8] sm:$0xff]   ;;  %v2901_v17 = vld [vmem:[%s4002_s3 + $0xe0] sm:$0xff]  }
 0x192   :  { %v792_v63 = vrot.slane %v603_v21, 6 }
 0x194   :  { %v793_v35 = vsel %vm641_vm2, %v790_v18, %v792_v63  ;;  %v2794_v6 = vpack.i.bf16 %v743_v57, %v792_v63  ;;  %v461_v57 = vadd.f32 %v3335_v59, %v3379_v36  ;;  %v2896_v18 = vld [vmem:[%s4002_s3 + $0xb8] sm:$0xff]  }
 0x195   :  { %v2774_v4 = vpack.i.bf16 %v793_v35, %v791_v0  ;;  %v2716_v24 = vpop.permute.xlu1 %2715  ;;  %v2897_v0 = vld [vmem:[%s4002_s3 + $0xf0] sm:$0xff]  }
 0x196   :  { %v2718_v19 = vunpack.i.h.bf16 %v2716_v24  ;;  %v2717_v20 = vunpack.i.l.bf16 %v2716_v24  ;;  %v577_v33 = vmax.f32 %v461_v57, 0.0  ;;  %v2905_v57 = vld [vmem:[%s4002_s3 + $0xd0] sm:$0xff]  }
 0x197   :  { %2775 = vrot.lane.b32.xlu1 %v2774_v4, %s3092_s17 }
 0x198   :  { %v808_v30 = vsel %vm807_vm4, %v804_v53, %v2717_v20  ;;  %v809_v31 = vsel %vm807_vm4, %v805_v55, %v2718_v19  ;;  %v2902_v19 = vld [vmem:[%s4002_s3 + $0xa0] sm:$0xff]   ;;  %v2903_v20 = vld [vmem:[%s4002_s3 + $0xd8] sm:$0xff]   ;;  %v2907_v53 = vld [vmem:[%s4002_s3 + $0xc8] sm:$0xff]  }
 0x19b   :  { %2785 = vrot.lane.b32.xlu1 %v2784_v5, %s3090_s0 }
 0x19f   :  { %2795 = vrot.lane.b32.xlu1 %v2794_v6, %s3092_s17  ;;  %s3095_s17 = smov [#allocation2]  }
 0x1a0   :  { %s2370_s18 = sshll.u32 %s3095_s17, 4  ;;  %s2371_s18 = int_to_ptr.vmem [resolvable:$true] %s2370_s18 }
 0x1a1   :  { %s3067_s19 = scalar_lea.vmem %s2371_s18, 64  ;;  %p3072_p1 = scmp.lt.s32.totalorder %s2371_s18, %s2371_s18 }
 0x1a2   :  { %p3068_p0 = scmp.ne.s32.totalorder %s2371_s18, %s3067_s19  ;;  %p3073_p2 = scmp.lt.s32.totalorder %s3067_s19, %s3067_s19 }
 0x1a4   :  { %p3074_p3 = por %p3073_p2, %p3072_p1 }
 0x1a6   :  { %p3075_p4 = pnand %p3074_p3, %p3068_p0 }
 0x1b1   :  { %v2721_v22 = vpop.permute.xlu0 %2720 }
 0x1b2   :  { %v2723_v26 = vunpack.i.h.bf16 %v2721_v22  ;;  %v2722_v27 = vunpack.i.l.bf16 %v2721_v22  ;;  %v2904_v22 = vld [vmem:[%s4002_s3 + $0x98] sm:$0xff]  }
 0x1b4   :  { %v815_v43 = vsel %vm803_vm3, %v577_v33, %v2722_v27  ;;  %v816_v45 = vsel %vm803_vm3, %v578_v34, %v2723_v26  ;;  %v2909_v26 = vld [vmem:[%s4002_s3 + $0xc0] sm:$0xff]   ;;  %v498_v27 = vadd.f32 %v3335_v59, %v3443_v50 }
 0x1b6   :  { %v586_v34 = vmax.f32 %v498_v27, 0.0  ;;  %v2917_v27 = vld [vmem:[%s4004_s5 + $0x60] sm:$0xff]  }
 0x1b9   :  { %v2726_v15 = vpop.permute.xlu1 %2725 }
 0x1ba   :  { %v2728_v32 = vunpack.i.h.bf16 %v2726_v15  ;;  %v2727_v36 = vunpack.i.l.bf16 %v2726_v15 }
 0x1bc   :  { %v818_v46 = vsel %vm807_vm4, %v815_v43, %v2727_v36  ;;  %v819_v47 = vsel %vm807_vm4, %v816_v45, %v2728_v32 }
 0x1bd   :  { %v2736_v25 = vpop.permute.xlu1 %2735 }
 0x1be   :  { %v2738_v28 = vunpack.i.h.bf16 %v2736_v25  ;;  %v2737_v29 = vunpack.i.l.bf16 %v2736_v25  ;;  %v2908_v25 = vld [vmem:[%s4002_s3 + $0x88] sm:$0xff]  }
 0x1c0   :  { %v812_v39 = vsel %vm811_vm5, %v808_v30, %v2737_v29  ;;  %v813_v37 = vsel %vm811_vm5, %v809_v31, %v2738_v28  ;;  %v501_v28 = vadd.f32 %v3335_v59, %v3448_v58  ;;  %v2910_v30 = vld [vmem:[%s4002_s3 + $0x80] sm:$0xff]  }
 0x1c1   :  { %v2731_v38 = vpop.permute.xlu0 %2730  ;;  %v842_v40 = vpack.c.bf16 %v813_v37, %v812_v39  ;;  %v2746_v21 = vpop.permute.xlu1 %2745 }
 0x1c2   :  { %v2733_v41 = vunpack.i.h.bf16 %v2731_v38  ;;  %v2732_v42 = vunpack.i.l.bf16 %v2731_v38  ;;  %v2748_v5 = vunpack.i.h.bf16 %v2746_v21  ;;  %v2747_v6 = vunpack.i.l.bf16 %v2746_v21 }
 0x1c3   :  { %v587_v39 = vmax.f32 %v501_v28, 0.0  ;;  %v2918_v28 = vld [vmem:[%s4004_s5 + $0x20] sm:$0xff]  }
 0x1c4   :  { %v821_v48 = vsel %vm811_vm5, %v818_v46, %v2732_v42  ;;  %v822_v49 = vsel %vm811_vm5, %v819_v47, %v2733_v41 }
 0x1c5   :  { %v2741_v51 = vpop.permute.xlu0 %2740  ;;  %v843_v56 = vpack.c.bf16 %v822_v49, %v821_v48  ;;  %v533_v48 = vadd.f32 %v3335_v59, %v3484_v52  ;;  %v538_v49 = vadd.f32 %v3335_v59, %v3488_v62 }
 0x1c6   :  { %v2743_v60 = vunpack.i.h.bf16 %v2741_v51  ;;  %v2742_v63 = vunpack.i.l.bf16 %v2741_v51 }
 0x1c7   :  { %1145 = vmatprep.mubr.bf16.mxu1 %v843_v56 }
 0x1c8   :  { %v806_v35 = vsel %vm803_vm3, %v570_v3, %v2743_v60  ;;  %v817_v4 = vsel %vm803_vm3, %v579_v54, %v2742_v63  ;;  %1146 = vmatmul.mubr.bf16.vlgmr.msra.gmra.mxu1 %v842_v40  ;;  %v595_v63 = vmax.f32 %v533_v48, 0.0  ;;  %v2925_v48 = vld [vmem:[%s4004_s5 + $0x40] sm:$0xff]  }
 0x1c9   :  { %v2751_v24 = vpop.permute.xlu0 %2750  ;;  %2614 = vmatpush3.bf16.msra.mxu1 %v2896_v18  ;;  %v820_v3 = vsel %vm807_vm4, %v817_v4, %v2747_v6  ;;  %v810_v44 = vsel %vm807_vm4, %v806_v35, %v2748_v5 }
 0x1ca   :  { %v2753_v11 = vunpack.i.h.bf16 %v2751_v24  ;;  %v2752_v12 = vunpack.i.l.bf16 %v2751_v24  ;;  %2615 = vmatprep.subr.bf16.mxu1 %v2897_v0  ;;  %v596_v0 = vmax.f32 %v538_v49, 0.0 }
 0x1cc   :  { %v823_v54 = vsel %vm811_vm5, %v820_v3, %v2752_v12  ;;  %v814_v10 = vsel %vm811_vm5, %v810_v44, %v2753_v11 }
 0x1cd   :  { %v847_v2 = vpack.c.bf16 %v823_v54, %v823_v54  ;;  %v846_v15 = vpack.c.bf16 %v814_v10, %v814_v10  ;;  %2616 = vmatpush3.bf16.msra.mxu1 %v2898_v9 }
 0x1ce   :  { %2617 = vmatprep.subr.bf16.mxu1 %v2899_v61 }
 0x1cf   :  { %1153 = vmatprep.mubr.bf16.mxu1 %v847_v2 }
 0x1d0   :  { %1154 = vmatmul.mubr.bf16.gmra.mxu1 %v846_v15 }
 0x1d1   :  { %2618 = vmatpush3.bf16.msra.mxu1 %v2900_v16 }
 0x1d2   :  { %2619 = vmatprep.subr.bf16.mxu1 %v2901_v17 }
 0x1d5   :  { %2620 = vmatpush3.bf16.msra.mxu1 %v2902_v19  ;;  %v2756_v55 = vpop.permute.xlu0 %2755 }
 0x1d6   :  { %2621 = vmatprep.subr.bf16.mxu1 %v2903_v20  ;;  %v2758_v31 = vunpack.i.h.bf16 %v2756_v55  ;;  %v2757_v32 = vunpack.i.l.bf16 %v2756_v55  ;;  %v2914_v55 = vld [vmem:[%s4004_s5 + $0x30] sm:$0xff]  }
 0x1d8   :  { %v825_v50 = vsel %vm803_vm3, %v587_v39, %v2758_v31  ;;  %v824_v38 = vsel %vm803_vm3, %v586_v34, %v2757_v32  ;;  %v2921_v31 = vld [vmem:[%s4004_s5 + $0x50] sm:$0xff]  }
 0x1d9   :  { %2622 = vmatpush3.bf16.msra.mxu1 %v2904_v22  ;;  %v2922_v32 = vld [vmem:[%s4004_s5 + $0x10] sm:$0xff]  }
 0x1da   :  { %2623 = vmatprep.subr.bf16.mxu1 %v2905_v57 }
 0x1dd   :  { %2624 = vmatpush3.bf16.msra.mxu1 %v2906_v23  ;;  %v2761_v29 = vpop.permute.xlu0 %2760 }
 0x1de   :  { %2625 = vmatprep.subr.bf16.mxu1 %v2907_v53  ;;  %v2763_v36 = vunpack.i.h.bf16 %v2761_v29  ;;  %v2762_v33 = vunpack.i.l.bf16 %v2761_v29  ;;  %v2913_v53 = vld [vmem:[%s4004_s5 + $0x70] sm:$0xff]   ;;  %v2919_v29 = vld [vmem:[%s4004_s5 + $0x58] sm:$0xff]  }
 0x1e0   :  { %v827_v41 = vsel %vm807_vm4, %v824_v38, %v2762_v33  ;;  %v828_v42 = vsel %vm807_vm4, %v825_v50, %v2763_v36  ;;  %v2923_v36 = vld [vmem:[%s4004_s5 + $0x48] sm:$0xff]  }
 0x1e1   :  { %2626 = vmatpush3.bf16.msra.mxu1 %v2908_v25  ;;  %v2915_v25 = vld [vmem:[%s4004_s5 + $0x68] sm:$0xff]  }
 0x1e2   :  { %2627 = vmatprep.subr.bf16.mxu1 %v2909_v26  ;;  %v2916_v26 = vld [vmem:[%s4004_s5 + $0x28] sm:$0xff]  }
 0x1e3   :  { %v2924_v33 = vld [vmem:[%s4004_s5 + $0x8] sm:$0xff]  }
 0x1e5   :  { %v2781_v37 = vpop.permute.xlu0 %2780  ;;  %2628 = vmatpush3.bf16.msra.mxu1 %v2910_v30  ;;  %v2920_v30 = vld [vmem:[%s4004_s5 + $0x18] sm:$0xff]  }
 0x1e6   :  { %v2783_v58 = vunpack.i.h.bf16 %v2781_v37  ;;  %v2782_v40 = vunpack.i.l.bf16 %v2781_v37  ;;  %2641 = vmatprep.subr.bf16.mxu1 %v2911_v7  ;;  %v2928_v7 = vld [vmem:[%s4004_s5 + $0xb8] sm:$0xff]  }
 0x1e8   :  { %v830_v43 = vsel %vm811_vm5, %v827_v41, %v2782_v40  ;;  %v831_v45 = vsel %vm811_vm5, %v828_v42, %v2783_v58 }
 0x1e9   :  { %v844_v46 = vpack.c.bf16 %v831_v45, %v830_v43  ;;  %v2431_v43 = vld [vmem:[%s4003_s4] ss:$0 sm:$0xff] }
 0x1f9   :  { %v2766_v47 = vpop.permute.xlu1 %2765 }
 0x1fa   :  { %v2768_v56 = vunpack.i.h.bf16 %v2766_v47  ;;  %v2767_v18 = vunpack.i.l.bf16 %v2766_v47 }
 0x1fc   :  { %v834_v4 = vsel %vm803_vm3, %v596_v0, %v2768_v56  ;;  %v833_v5 = vsel %vm803_vm3, %v595_v63, %v2767_v18 }
 0x200   :  { %v2791_v61 = vpop.permute.xlu0 %2790 }
 0x201   :  { %v2771_v51 = vpop.permute.xlu1 %2770  ;;  %v2793_v2 = vunpack.i.h.bf16 %v2791_v61  ;;  %v2792_v15 = vunpack.i.l.bf16 %v2791_v61 }
 0x202   :  { %v2773_v21 = vunpack.i.h.bf16 %v2771_v51  ;;  %v2772_v60 = vunpack.i.l.bf16 %v2771_v51  ;;  %v2926_v51 = vld [vmem:[%s4004_s5] sm:$0xff]  }
 0x204   :  { %v836_v9 = vsel %vm807_vm4, %v833_v5, %v2772_v60  ;;  %v837_v52 = vsel %vm807_vm4, %v834_v4, %v2773_v21  ;;  %v2927_v60 = vld [vmem:[%s4004_s5 + $0xf8] sm:$0xff]  }
 0x209   :  { %v2776_v35 = vpop.permute.xlu1 %2775 }
 0x20a   :  { %v2778_v6 = vunpack.i.h.bf16 %v2776_v35  ;;  %v2777_v24 = vunpack.i.l.bf16 %v2776_v35 }
 0x20c   :  { %v839_v59 = vsel %vm811_vm5, %v836_v9, %v2777_v24  ;;  %v840_v62 = vsel %vm811_vm5, %v837_v52, %v2778_v6 }
 0x20d   :  { %v2786_v11 = vpop.permute.xlu1 %2785  ;;  %v845_v12 = vpack.c.bf16 %v840_v62, %v839_v59 }
 0x20e   :  { %v2788_v3 = vunpack.i.h.bf16 %v2786_v11  ;;  %v2787_v44 = vunpack.i.l.bf16 %v2786_v11 }
 0x20f   :  { %1193 = vmatprep.mubr.bf16.mxu1 %v845_v12 }
 0x210   :  { %v826_v54 = vsel %vm803_vm3, %v588_v13, %v2788_v3  ;;  %v835_v10 = vsel %vm803_vm3, %v597_v14, %v2787_v44  ;;  %1194 = vmatmul.mubr.bf16.vlgmr.msra.gmra.mxu1 %v844_v46  ;;  %v2912_v14 = vld [vmem:[%s4004_s5 + $0x38] sm:$0xff]  }
 0x211   :  { %v2796_v16 = vpop.permute.xlu1 %2795  ;;  %v838_v20 = vsel %vm807_vm4, %v835_v10, %v2792_v15  ;;  %v829_v22 = vsel %vm807_vm4, %v826_v54, %v2793_v2  ;;  %2642 = vmatpush3.bf16.msra.mxu1 %v2912_v14 }
 0x212   :  { %v2798_v17 = vunpack.i.h.bf16 %v2796_v16  ;;  %v2797_v19 = vunpack.i.l.bf16 %v2796_v16  ;;  %2643 = vmatprep.subr.bf16.mxu1 %v2913_v53  ;;  %v2929_v53 = vld [vmem:[%s4004_s5 + $0xf0] sm:$0xff]  }
 0x214   :  { %v841_v57 = vsel %vm811_vm5, %v838_v20, %v2797_v19  ;;  %v832_v8 = vsel %vm811_vm5, %v829_v22, %v2798_v17 }
 0x215   :  { %v849_v23 = vpack.c.bf16 %v841_v57, %v841_v57  ;;  %v848_v13 = vpack.c.bf16 %v832_v8, %v832_v8  ;;  %2644 = vmatpush3.bf16.msra.mxu1 %v2914_v55 }
 0x216   :  { %2645 = vmatprep.subr.bf16.mxu1 %v2915_v25 }
 0x217   :  { %1201 = vmatprep.mubr.bf16.mxu1 %v849_v23 }
 0x218   :  { %1202 = vmatmul.mubr.bf16.gmra.mxu1 %v848_v13 }
 0x219   :  { %2646 = vmatpush3.bf16.msra.mxu1 %v2916_v26 }
 0x21a   :  { %2647 = vmatprep.subr.bf16.mxu1 %v2917_v27  ;;  %v2930_v27 = vld [vmem:[%s4004_s5 + $0xb0] sm:$0xff]  }
 0x21d   :  { %2648 = vmatpush3.bf16.msra.mxu1 %v2918_v28  ;;  %v2931_v28 = vld [vmem:[%s4004_s5 + $0xe8] sm:$0xff]  }
 0x21e   :  { %2649 = vmatprep.subr.bf16.mxu1 %v2919_v29  ;;  %v2932_v29 = vld [vmem:[%s4004_s5 + $0xa8] sm:$0xff]  }
 0x221   :  { %2650 = vmatpush3.bf16.msra.mxu1 %v2920_v30  ;;  %v2933_v30 = vld [vmem:[%s4004_s5 + $0xe0] sm:$0xff]  }
 0x222   :  { %2651 = vmatprep.subr.bf16.mxu1 %v2921_v31  ;;  %v2934_v31 = vld [vmem:[%s4004_s5 + $0xa0] sm:$0xff]  }
 0x225   :  { %2652 = vmatpush3.bf16.msra.mxu1 %v2922_v32  ;;  %v2935_v32 = vld [vmem:[%s4004_s5 + $0xd8] sm:$0xff]  }
 0x226   :  { %2653 = vmatprep.subr.bf16.mxu1 %v2923_v36  ;;  %v2936_v36 = vld [vmem:[%s4004_s5 + $0x98] sm:$0xff]  }
 0x229   :  { %2654 = vmatpush3.bf16.msra.mxu1 %v2924_v33  ;;  %v2937_v33 = vld [vmem:[%s4004_s5 + $0xd0] sm:$0xff]  }
 0x22a   :  { %2655 = vmatprep.subr.bf16.mxu1 %v2925_v48 }
 0x22d   :  { %2656 = vmatpush3.bf16.msra.mxu1 %v2926_v51  ;;  %v2949_v51 = vld [vmem:[%s4006_s7 + $0x64] ss:$16 sps:$4 sm:$0xff]  }
 0x22e   :  { %2663 = vmatprep.subr.bf16.mxu1 %v2927_v60  ;;  %v2955_v60 = vld [vmem:[%s4006_s7 + $0x24] ss:$16 sps:$4 sm:$0xff]  }
 0x288   :  { %v2601_v34 = vpop.f32.mrf.mxu1 }
 0x28a   :  { %v2602_v39 = vpop.f32.mrf.mxu1 }
 0x28b   :  { %v2603_v37 = vadd.f32 %v2602_v39, %v2601_v34  ;;  %v2938_v34 = vld [vmem:[%s4004_s5 + $0x90] sm:$0xff]   ;;  %v2939_v39 = vld [vmem:[%s4004_s5 + $0xc8] sm:$0xff]  }
 0x28c   :  { %v2604_v50 = vpop.f32.mrf.mxu1 }
 0x28d   :  { %v1148_v18 = vadd.f32 %v2603_v37, %v2431_v43  ;;  %v2940_v37 = vld [vmem:[%s4004_s5 + $0x88] sm:$0xff]  }
 0x28e   :  { %v2605_v38 = vpop.f32.mrf.mxu1 }
 0x28f   :  { %v2606_v58 = vadd.f32 %v2605_v38, %v2604_v50  ;;  %v2941_v50 = vld [vmem:[%s4004_s5 + $0xc0] sm:$0xff]  }
 0x290   :  { %v2607_v40 = vpop.f32.mrf.mxu1 }
 0x291   :  { %v1151_v4 = vadd.f32 %v2606_v58, %v2431_v43  ;;  %v2942_v58 = vld [vmem:[%s4004_s5 + $0x80] sm:$0xff]  }
 0x292   :  { %v2608_v41 = vpop.f32.mrf.mxu1 }
 0x293   :  { %v2609_v42 = vadd.f32 %v2608_v41, %v2607_v40  ;;  %v2943_v41 = vld [vmem:[%s4004_s5 + $0x118] sm:$0xff]  }
 0x294   :  { %v2610_v45 = vpop.f32.mrf.mxu1 }
 0x295   :  { %v1156_v46 = vadd.f32 %v2609_v42, %v2431_v43  ;;  %v3093_v43 = vmov 0.0   ;;  %v2944_v45 = vld [vmem:[%s4004_s5 + $0x110] sm:$0xff]  }
 0x296   :  { %v2611_v47 = vpop.f32.mrf.mxu1 }
 0x297   :  { %v2946_v47 = vld [vmem:[%s4004_s5 + $0x100] sm:$0xff]  }
 0x2d0   :  { %v2629_v49 = vpop.f32.mrf.mxu1 }
 0x2d2   :  { %v2630_v56 = vpop.f32.mrf.mxu1 }
 0x2d3   :  { %v2631_v21 = vadd.f32 %v2630_v56, %v2629_v49  ;;  %v2947_v56 = vld [vmem:[%s4006_s7 + $0x60] ss:$16 sps:$4 sm:$0xff]  }
 0x2d4   :  { %v2632_v63 = vpop.f32.mrf.mxu1 }
 0x2d5   :  { %v1196_v0 = vadd.f32 %v2631_v21, %v1148_v18  ;;  %v2952_v18 = vld [vmem:[%s4006_s7 + $0x44] ss:$16 sps:$4 sm:$0xff]   ;;  %v2950_v21 = vld [vmem:[%s4006_s7 + $0x40] ss:$16 sps:$4 sm:$0xff]  }
 0x2d6   :  { %v2633_v35 = vpop.f32.mrf.mxu1 }
 0x2d7   :  { %v1209_v5 = vmax.f32 %v1196_v0, 0.0  ;;  %v2634_v6 = vadd.f32 %v2633_v35, %v2632_v63  ;;  %v2953_v63 = vld [vmem:[%s4006_s7 + $0x20] ss:$16 sps:$4 sm:$0xff]   ;;  %v2958_v0 = vld [vmem:[%s4006_s7 + $0x4] ss:$16 sps:$4 sm:$0xff]  }
 0x2d8   :  { %v2635_v24 = vpop.f32.mrf.mxu1  ;;  %v2956_v35 = vld [vmem:[%s4006_s7] ss:$16 sps:$4 sm:$0xff]  }
 0x2d9   :  { %v1199_v9 = vadd.f32 %v2634_v6, %v1151_v4  ;;  %v1213_v52 = vrot.slane %v1209_v5, 2  ;;  %v1219_v59 = vrot.slane %v1209_v5, 6  ;;  %v1217_v20 = vrot.slane %v1209_v5, 4  ;;  %v2961_v4 = vld [vmem:[%s4006_s7 + $0x6c] ss:$16 sps:$4 sm:$0xff]  }
 0x2da   :  { %v2636_v62 = vpop.f32.mrf.mxu1  ;;  %v2973_v6 = vld [vmem:[%s4008_s9 + $0x74] ss:$8 sps:$4 sm:$0xff]  }
 0x2db   :  { %v1210_v11 = vmax.f32 %v1199_v9, 0.0  ;;  %v2637_v12 = vadd.f32 %v2636_v62, %v2635_v24  ;;  %v2799_v61 = vpack.i.bf16 %v1213_v52, %v1219_v59  ;;  %v2976_v24 = vld [vmem:[%s4008_s9 + $0x64] ss:$8 sps:$4 sm:$0xff]   ;;  %2270 = vmatprep.subr.bf16.mxu0 %v2973_v6  ;;  %v2974_v9 = vld [vmem:[%s4008_s9 + $0x60] ss:$8 sps:$4 sm:$0xff]  }
 0x2dc   :  { %v2638_v3 = vpop.f32.mrf.mxu1  ;;  %v2979_v52 = vld [vmem:[%s4008_s9 + $0x54] ss:$8 sps:$4 sm:$0xff]   ;;  %v2977_v59 = vld [vmem:[%s4008_s9 + $0x50] ss:$8 sps:$4 sm:$0xff]   ;;  %v2982_v62 = vld [vmem:[%s4008_s9 + $0x44] ss:$8 sps:$4 sm:$0xff]  }
 0x2dd   :  { %v3676_v44 = vadd.f32 %v2637_v12, %v1156_v46  ;;  %2800 = vrot.lane.b32.xlu0 %v2799_v61, %s3091_s12  ;;  %v1224_v54 = vrot.slane %v1210_v11, 2  ;;  %v1230_v10 = vrot.slane %v1210_v11, 6  ;;  %v1228_v55 = vrot.slane %v1210_v11, 4  ;;  %v2945_v46 = vld [vmem:[%s4004_s5 + $0x108] sm:$0xff]   ;;  %v2985_v12 = vld [vmem:[%s4008_s9 + $0x34] ss:$8 sps:$4 sm:$0xff]  }
 0x2de   :  { %v2639_v2 = vpop.f32.mrf.mxu1  ;;  %v2983_v61 = vld [vmem:[%s4008_s9 + $0x30] ss:$8 sps:$4 sm:$0xff]   ;;  %v2988_v3 = vld [vmem:[%s4008_s9 + $0x24] ss:$8 sps:$4 sm:$0xff]  }
 0x2df   :  { %v2804_v15 = vpack.i.bf16 %v1224_v54, %v1230_v10  ;;  %v1211_v48 = vmax.f32 %v3676_v44, 0.0  ;;  %v2986_v44 = vld [vmem:[%s4008_s9 + $0x20] ss:$8 sps:$4 sm:$0xff]   ;;  %v2991_v54 = vld [vmem:[%s4008_s9 + $0x14] ss:$8 sps:$4 sm:$0xff]  }
 0x2e0   :  { %v2989_v10 = vld [vmem:[%s4008_s9 + $0x10] ss:$8 sps:$4 sm:$0xff]   ;;  %v2994_v2 = vld [vmem:[%s4008_s9 + $0x4] ss:$8 sps:$4 sm:$0xff]  }
 0x2e1   :  { %2805 = vrot.lane.b32.xlu1 %v2804_v15, %s3091_s12  ;;  %v1242_v49 = vpack.c.bf16 %v1211_v48, %v1211_v48  ;;  %v2992_v15 = vld [vmem:[%s4008_s9] ss:$8 sps:$4 sm:$0xff]   ;;  %v3024_v6 = vld [vmem:[%s4008_s9 + $0x124] ss:$8 sps:$4 sm:$0xff]  }
 0x2e2   :  { %v2965_v48 = vld [vmem:[%s4006_s7 + $0x28] ss:$16 sps:$4 sm:$0xff]  }
 0x34f   :  { %v2801_v16 = vpop.permute.xlu0 %2800 }
 0x350   :  { %v2803_v17 = vunpack.i.h.bf16 %v2801_v16  ;;  %v2802_v19 = vunpack.i.l.bf16 %v2801_v16  ;;  %v2997_v16 = vld [vmem:[%s4008_s9 + $0xf4] ss:$8 sps:$4 sm:$0xff]  }
 0x352   :  { %v1234_v22 = vsel %vm807_vm4, %v1209_v5, %v2803_v17  ;;  %v1235_v57 = vsel %vm807_vm4, %v1217_v20, %v2802_v19  ;;  %v2971_v5 = vld [vmem:[%s4008_s9 + $0x70] ss:$8 sps:$4 sm:$0xff]   ;;  %v3000_v19 = vld [vmem:[%s4008_s9 + $0xe4] ss:$8 sps:$4 sm:$0xff]   ;;  %v2998_v20 = vld [vmem:[%s4008_s9 + $0xe0] ss:$8 sps:$4 sm:$0xff]  }
 0x353   :  { %v1238_v8 = vpack.c.bf16 %v1234_v22, %v1234_v22  ;;  %v2806_v23 = vpop.permute.xlu1 %2805  ;;  %v1239_v13 = vpack.c.bf16 %v1235_v57, %v1235_v57  ;;  %2271 = vmatpush1.bf16.msra.mxu0 %v2971_v5  ;;  %v2995_v17 = vld [vmem:[%s4008_s9 + $0xf0] ss:$8 sps:$4 sm:$0xff]   ;;  %v3009_v22 = vld [vmem:[%s4008_s9 + $0xd4] ss:$8 sps:$4 sm:$0xff]  }
 0x354   :  { %v2807_v14 = vunpack.i.l.bf16 %v2806_v23  ;;  %v2808_v38 = vunpack.i.h.bf16 %v2806_v23  ;;  %2272 = vmatprep.subr.bf16.mxu0 %v2976_v24  ;;  %v3007_v57 = vld [vmem:[%s4008_s9 + $0xd0] ss:$8 sps:$4 sm:$0xff]   ;;  %v3016_v23 = vld [vmem:[%s4008_s9 + $0xc0] ss:$8 sps:$4 sm:$0xff]  }
 0x355   :  { %1573 = vmatprep.mubr.bf16.mxu1 %v1239_v13  ;;  %v3030_v13 = vld [vmem:[%s4008_s9 + $0xb4] ss:$8 sps:$4 sm:$0xff]   ;;  %v3019_v5 = vld [vmem:[%s4008_s9 + $0x130] ss:$8 sps:$4 sm:$0xff]   ;;  %v3022_v24 = vld [vmem:[%s4008_s9 + $0x120] ss:$8 sps:$4 sm:$0xff]  }
 0x356   :  { %1574 = vmatmul.mubr.bf16.vlgmr.msra.gmra.mxu1 %v1238_v8  ;;  %v1237_v25 = vsel %vm807_vm4, %v1228_v55, %v2807_v14  ;;  %v1236_v40 = vsel %vm807_vm4, %v1210_v11, %v2808_v38  ;;  %v2980_v11 = vld [vmem:[%s4008_s9 + $0x40] ss:$8 sps:$4 sm:$0xff]   ;;  %v3018_v8 = vld [vmem:[%s4008_s9 + $0xc4] ss:$8 sps:$4 sm:$0xff]  }
 0x357   :  { %2664 = vmatpush3.bf16.msra.mxu1 %v2928_v7  ;;  %v1241_v26 = vpack.c.bf16 %v1237_v25, %v1237_v25  ;;  %v1240_v42 = vpack.c.bf16 %v1236_v40, %v1236_v40  ;;  %2273 = vmatpush1.bf16.msra.mxu0 %v2974_v9  ;;  %v3028_v7 = vld [vmem:[%s4008_s9 + $0xb0] ss:$8 sps:$4 sm:$0xff]   ;;  %v3039_v14 = vld [vmem:[%s4008_s9 + $0xa4] ss:$8 sps:$4 sm:$0xff]   ;;  %v3027_v9 = vld [vmem:[%s4008_s9 + $0x114] ss:$8 sps:$4 sm:$0xff]  }
 0x358   :  { %2665 = vmatprep.subr.bf16.mxu1 %v2929_v53  ;;  %2274 = vmatprep.subr.bf16.mxu0 %v2979_v52  ;;  %v3037_v53 = vld [vmem:[%s4008_s9 + $0xa0] ss:$8 sps:$4 sm:$0xff]   ;;  %v3025_v52 = vld [vmem:[%s4008_s9 + $0x110] ss:$8 sps:$4 sm:$0xff]  }
 0x359   :  { %1613 = vmatprep.mubr.bf16.mxu1 %v1241_v26 }
 0x35b   :  { %2666 = vmatpush3.bf16.msra.mxu1 %v2930_v27  ;;  %2275 = vmatpush1.bf16.msra.mxu0 %v2977_v59  ;;  %v3033_v59 = vld [vmem:[%s4008_s9 + $0x104] ss:$8 sps:$4 sm:$0xff]  }
 0x35c   :  { %2667 = vmatprep.subr.bf16.mxu1 %v2931_v28  ;;  %2276 = vmatprep.subr.bf16.mxu0 %v2982_v62  ;;  %v3031_v62 = vld [vmem:[%s4008_s9 + $0x100] ss:$8 sps:$4 sm:$0xff]  }
 0x35f   :  { %2668 = vmatpush3.bf16.msra.mxu1 %v2932_v29  ;;  %2277 = vmatpush1.bf16.msra.mxu0 %v2980_v11  ;;  %v3036_v11 = vld [vmem:[%s4008_s9 + $0x1f4] ss:$8 sps:$4 sm:$0xff]  }
 0x360   :  { %2669 = vmatprep.subr.bf16.mxu1 %v2933_v30  ;;  %2278 = vmatprep.subr.bf16.mxu0 %v2985_v12  ;;  %v3034_v12 = vld [vmem:[%s4008_s9 + $0x1f0] ss:$8 sps:$4 sm:$0xff]  }
 0x363   :  { %2670 = vmatpush3.bf16.msra.mxu1 %v2934_v31  ;;  %2279 = vmatpush1.bf16.msra.mxu0 %v2983_v61  ;;  %v3042_v61 = vld [vmem:[%s4008_s9 + $0x1e4] ss:$8 sps:$4 sm:$0xff]  }
 0x364   :  { %2671 = vmatprep.subr.bf16.mxu1 %v2935_v32  ;;  %2280 = vmatprep.subr.bf16.mxu0 %v2988_v3  ;;  %v3040_v3 = vld [vmem:[%s4008_s9 + $0x1e0] ss:$8 sps:$4 sm:$0xff]  }
 0x367   :  { %2672 = vmatpush3.bf16.msra.mxu1 %v2936_v36  ;;  %2281 = vmatpush1.bf16.msra.mxu0 %v2986_v44  ;;  %v2464_v36 = vld [vmem:[%s4005_s6] ss:$0 sm:$0xff]  ;;  %v3045_v44 = vld [vmem:[%s4008_s9 + $0x1d4] ss:$8 sps:$4 sm:$0xff]  }
 0x368   :  { %2673 = vmatprep.subr.bf16.mxu1 %v2937_v33  ;;  %2282 = vmatprep.subr.bf16.mxu0 %v2991_v54  ;;  %v3043_v54 = vld [vmem:[%s4008_s9 + $0x1d0] ss:$8 sps:$4 sm:$0xff]  }
 0x36b   :  { %2674 = vmatpush3.bf16.msra.mxu1 %v2938_v34  ;;  %2283 = vmatpush1.bf16.msra.mxu0 %v2989_v10  ;;  %v3048_v10 = vld [vmem:[%s4008_s9 + $0x94] ss:$8 sps:$4 sm:$0xff]  }
 0x36c   :  { %2675 = vmatprep.subr.bf16.mxu1 %v2939_v39  ;;  %2284 = vmatprep.subr.bf16.mxu0 %v2994_v2  ;;  %v3046_v2 = vld [vmem:[%s4008_s9 + $0x90] ss:$8 sps:$4 sm:$0xff]  }
 0x36f   :  { %2676 = vmatpush3.bf16.msra.mxu1 %v2940_v37  ;;  %2285 = vmatpush1.bf16.msra.mxu0 %v2992_v15  ;;  %v3051_v15 = vld [vmem:[%s4008_s9 + $0x1c4] ss:$8 sps:$4 sm:$0xff]  }
 0x370   :  { %2677 = vmatprep.subr.bf16.mxu1 %v2941_v50  ;;  %2286 = vmatprep.subr.bf16.mxu0 %v2997_v16  ;;  %v3049_v16 = vld [vmem:[%s4008_s9 + $0x1c0] ss:$8 sps:$4 sm:$0xff]  }
 0x373   :  { %2678 = vmatpush3.bf16.msra.mxu1 %v2942_v58  ;;  %2287 = vmatpush2.bf16.msra.mxu0 %v2995_v17  ;;  %v3054_v17 = vld [vmem:[%s4008_s9 + $0x84] ss:$8 sps:$4 sm:$0xff]  }
 0x374   :  { %2690 = vmatprep.subr.bf16.mxu1 %v3093_v43  ;;  %2288 = vmatprep.subr.bf16.mxu0 %v3000_v19  ;;  %v3052_v19 = vld [vmem:[%s4008_s9 + $0x80] ss:$8 sps:$4 sm:$0xff]  }
 0x376   :  { %1614 = vmatmul.mubr.bf16.vlgmr.msra.gmra.mxu1 %v1240_v42 }
 0x377   :  { %2691 = vmatpush3.bf16.msra.mxu1 %v2943_v41  ;;  %2698 = vmatprep.mubr.msk.bf16.mxu1 %vm3094_vm6, %v3093_v43  ;;  %v2959_v41 = vld [vmem:[%s4006_s7 + $0x68] ss:$16 sps:$4 sm:$0xff]  }
 0x378   :  { %2692 = vmatprep.subr.bf16.mxu1 %v3093_v43  ;;  %2289 = vmatpush2.bf16.msra.mxu0 %v2998_v20  ;;  %v3057_v20 = vld [vmem:[%s4008_s9 + $0x1b4] ss:$8 sps:$4 sm:$0xff]  }
 0x379   :  { %2290 = vmatprep.subr.bf16.mxu0 %v3009_v22  ;;  %v3055_v22 = vld [vmem:[%s4008_s9 + $0x1b0] ss:$8 sps:$4 sm:$0xff]  }
 0x37b   :  { %2693 = vmatpush3.bf16.msra.mxu1 %v2944_v45 }
 0x37c   :  { %2694 = vmatprep.subr.bf16.mxu1 %v3093_v43  ;;  %2291 = vmatpush2.bf16.msra.mxu0 %v3007_v57  ;;  %v3060_v57 = vld [vmem:[%s4008_s9 + $0x1a4] ss:$8 sps:$4 sm:$0xff]  }
 0x37d   :  { %2292 = vmatprep.subr.bf16.mxu0 %v3018_v8  ;;  %v3058_v8 = vld [vmem:[%s4008_s9 + $0x1a0] ss:$8 sps:$4 sm:$0xff]  }
 0x37f   :  { %2695 = vmatpush3.bf16.msra.mxu1 %v2945_v46  ;;  %v2962_v46 = vld [vmem:[%s4006_s7 + $0x48] ss:$16 sps:$4 sm:$0xff]  }
 0x380   :  { %2696 = vmatprep.subr.bf16.mxu1 %v3093_v43  ;;  %2293 = vmatpush2.bf16.msra.mxu0 %v3016_v23  ;;  %v2964_v43 = vld [vmem:[%s4006_s7 + $0x4c] ss:$16 sps:$4 sm:$0xff]  }
 0x381   :  { %2294 = vmatprep.subr.bf16.mxu0 %v3030_v13  ;;  %v3063_v23 = vld [vmem:[%s4008_s9 + $0x194] ss:$8 sps:$4 sm:$0xff]   ;;  %v3061_v13 = vld [vmem:[%s4008_s9 + $0x190] ss:$8 sps:$4 sm:$0xff]  }
 0x383   :  { %2697 = vmatpush3.bf16.msra.mxu1 %v2946_v47  ;;  %v2967_v47 = vld [vmem:[%s4006_s7 + $0x2c] ss:$16 sps:$4 sm:$0xff]  }
 0x384   :  { %1792 = vmatprep.subr.bf16.mxu1 %v2949_v51  ;;  %2295 = vmatpush2.bf16.msra.mxu0 %v3028_v7  ;;  %v3003_v51 = vld [vmem:[%s4008_s9 + $0x174] ss:$8 sps:$4 sm:$0xff]   ;;  %v3066_v7 = vld [vmem:[%s4008_s9 + $0x184] ss:$8 sps:$4 sm:$0xff]  }
 0x385   :  { %2296 = vmatprep.subr.bf16.mxu0 %v3039_v14  ;;  %v3064_v14 = vld [vmem:[%s4008_s9 + $0x180] ss:$8 sps:$4 sm:$0xff]  }
 0x386   :  { %2699 = vmatmul.mubr.msk.bf16.vlgmr.msra.gmra.mxu1 %vm807_vm4, %v1242_v49  ;;  %v2970_v49 = vld [vmem:[%s4006_s7 + $0xc] ss:$16 sps:$4 sm:$0xff]  }
 0x387   :  { %1816 = vmatprep.mubr.bf16.mxu1 %v3089_v1  ;;  %1793 = vmatpush1.bf16.msra.mxu1 %v2947_v56  ;;  %v3001_v56 = vld [vmem:[%s4008_s9 + $0x170] ss:$8 sps:$4 sm:$0xff]  }
 0x388   :  { %1794 = vmatprep.subr.bf16.mxu1 %v2952_v18  ;;  %2297 = vmatpush2.bf16.msra.mxu0 %v3037_v53  ;;  %v3006_v18 = vld [vmem:[%s4008_s9 + $0x164] ss:$8 sps:$4 sm:$0xff]   ;;  %v1681_v53 = vlaneseq }
 0x389   :  { %2298 = vmatprep.subr.bf16.mxu0 %v3048_v10 }
 0x38b   :  { %1795 = vmatpush1.bf16.msra.mxu1 %v2950_v21  ;;  %v3004_v21 = vld [vmem:[%s4008_s9 + $0x160] ss:$8 sps:$4 sm:$0xff]  }
 0x38c   :  { %1796 = vmatprep.subr.bf16.mxu1 %v2955_v60  ;;  %v3012_v60 = vld [vmem:[%s4008_s9 + $0x154] ss:$8 sps:$4 sm:$0xff]   ;;  %2299 = vmatpush2.bf16.msra.mxu0 %v3046_v2 }
 0x38d   :  { %2300 = vmatprep.subr.bf16.mxu0 %v3054_v17 }
 0x38f   :  { %1797 = vmatpush1.bf16.msra.mxu1 %v2953_v63  ;;  %v3010_v63 = vld [vmem:[%s4008_s9 + $0x150] ss:$8 sps:$4 sm:$0xff]  }
 0x390   :  { %1798 = vmatprep.subr.bf16.mxu1 %v2958_v0  ;;  %v3015_v0 = vld [vmem:[%s4008_s9 + $0x144] ss:$8 sps:$4 sm:$0xff]   ;;  %2301 = vmatpush2.bf16.msra.mxu0 %v3052_v19 }
 0x393   :  { %1799 = vmatpush1.bf16.msra.mxu1 %v2956_v35  ;;  %v3013_v35 = vld [vmem:[%s4008_s9 + $0x140] ss:$8 sps:$4 sm:$0xff]  }
 0x394   :  { %1833 = vmatprep.subr.bf16.mxu1 %v2961_v4  ;;  %v3021_v4 = vld [vmem:[%s4008_s9 + $0x134] ss:$8 sps:$4 sm:$0xff]  }
 0x416   :  { %v2657_v55 = vpop.f32.mrf.mxu1 }
 0x418   :  { %v2658_v25 = vpop.f32.mrf.mxu1 }
 0x419   :  { %v2659_v32 = vadd.f32 %v2658_v25, %v2657_v55  ;;  %v1682_v55 = vshrl.u32 %v1681_v53, 7 }
 0x41a   :  { %v2660_v26 = vpop.f32.mrf.mxu1 }
 0x41b   :  { %v1576_v34 = vadd.f32 %v2659_v32, %v2464_v36  ;;  %v1683_v25 = vsub.s32 0, %v1682_v55  ;;  %v1679_v26 = vld [vmem:[%s4007_s8] sm:$0xf] }
 0x41c   :  { %v2661_v27 = vpop.f32.mrf.mxu1 }
 0x41d   :  { %v1687_v27 = vsub.s32 1, %v1682_v55 }
 0x436   :  { %v2679_v28 = vpop.f32.mrf.mxu1 }
 0x438   :  { %v2680_v29 = vpop.f32.mrf.mxu1 }
 0x439   :  { %v2681_v33 = vadd.f32 %v2680_v29, %v2679_v28  ;;  %v1684_v28 = vrot.slane %v1679_v26, %v1683_v25  ;;  %v1688_v29 = vrot.slane %v1679_v26, %v1687_v27 }
 0x43a   :  { %v2682_v30 = vpop.f32.mrf.mxu1 }
 0x43b   :  { %v1616_v39 = vadd.f32 %v2681_v33, %v1576_v34 }
 0x43c   :  { %v2683_v31 = vpop.f32.mrf.mxu1 }
 0x446   :  { %v1655_v37 = vpop.f32.mrf.mxu1 }
 0x447   :  { %v1656_v50 = vadd.f32 %v1655_v37, %v1616_v39 }
 0x448   :  { %v2700_v38 = vpop.f32.mrf.mxu1 }
 0x449   :  { %v1661_v58 = vmax.f32 %v1656_v50, 0.0 }
 0x44a   :  { %v1658_v40 = vpop.f32.mrf.mxu1 }
 0x44b   :  { %v1662_v42 = vpack.c.bf16 %v1661_v58, %v1661_v58  ;;  %v1691_v58 = vsub.s32 2, %v1682_v55  ;;  %v1695_v40 = vsub.s32 3, %v1682_v55 }
 0x44c   :  { %v2701_v45 = vpop.f32.mrf.mxu1 }
 0x44d   :  { %2518 = vmatmul.mubr.msk.bf16.vlgmr.msra.gmra.mxu1 %vm807_vm4, %v1662_v42 }
 0x44e   :  { %1834 = vmatpush1.bf16.msra.mxu1 %v2959_v41  ;;  %1857 = vmatprep.mubr.bf16.mxu1 %v3089_v1  ;;  %v2968_v1 = vld [vmem:[%s4006_s7 + $0x8] ss:$16 sps:$4 sm:$0xff]   ;;  %v1692_v41 = vrot.slane %v1679_v26, %v1691_v58 }
 0x44f   :  { %1835 = vmatprep.subr.bf16.mxu1 %v2964_v43 }
 0x452   :  { %1836 = vmatpush1.bf16.msra.mxu1 %v2962_v46 }
 0x453   :  { %1837 = vmatprep.subr.bf16.mxu1 %v2967_v47 }
 0x456   :  { %1838 = vmatpush1.bf16.msra.mxu1 %v2965_v48 }
 0x457   :  { %1839 = vmatprep.subr.bf16.mxu1 %v2970_v49 }
 0x45a   :  { %1840 = vmatpush1.bf16.msra.mxu1 %v2968_v1 }
 0x45b   :  { %2311 = vmatprep.subr.bf16.mxu1 %v3003_v51 }
 0x45d   :  { %2519 = vmatmul.mubr.msk.bf16.vlgmr.msra.gmra.mxu1 %vm807_vm4, %v1662_v42  ;;  %v1696_v42 = vrot.slane %v1679_v26, %v1695_v40 }
 0x45e   :  { %2312 = vmatpush1.bf16.msra.mxu1 %v3001_v56 }
 0x45f   :  { %2313 = vmatprep.subr.bf16.mxu1 %v3006_v18 }
 0x462   :  { %2314 = vmatpush1.bf16.msra.mxu1 %v3004_v21 }
 0x463   :  { %2315 = vmatprep.subr.bf16.mxu1 %v3012_v60 }
 0x466   :  { %2316 = vmatpush1.bf16.msra.mxu1 %v3010_v63 }
 0x467   :  { %2317 = vmatprep.subr.bf16.mxu1 %v3015_v0 }
 0x46a   :  { %2318 = vmatpush1.bf16.msra.mxu1 %v3013_v35  ;;  %v1938_v35 = vld [vmem:[%s4009_s10] sm:$0x3] }
 0x46b   :  { %2319 = vmatprep.subr.bf16.mxu1 %v3021_v4  ;;  %v1943_v4 = vrot.slane %v1938_v35, %v1683_v25 }
 0x46e   :  { %2320 = vmatpush1.bf16.msra.mxu1 %v3019_v5  ;;  %v1947_v5 = vrot.slane %v1938_v35, %v1687_v27 }
 0x46f   :  { %2321 = vmatprep.subr.bf16.mxu1 %v3024_v6 }
 0x472   :  { %2322 = vmatpush1.bf16.msra.mxu1 %v3022_v24 }
 0x473   :  { %2323 = vmatprep.subr.bf16.mxu1 %v3027_v9 }
 0x476   :  { %2324 = vmatpush1.bf16.msra.mxu1 %v3025_v52 }
 0x477   :  { %2325 = vmatprep.subr.bf16.mxu1 %v3033_v59 }
 0x47a   :  { %2326 = vmatpush1.bf16.msra.mxu1 %v3031_v62 }
 0x47b   :  { %2327 = vmatprep.subr.bf16.mxu1 %v3036_v11 }
 0x47e   :  { %2328 = vmatpush2.bf16.msra.mxu1 %v3034_v12 }
 0x47f   :  { %2329 = vmatprep.subr.bf16.mxu1 %v3042_v61 }
 0x482   :  { %2330 = vmatpush2.bf16.msra.mxu1 %v3040_v3 }
 0x483   :  { %2331 = vmatprep.subr.bf16.mxu1 %v3045_v44 }
 0x486   :  { %2332 = vmatpush2.bf16.msra.mxu1 %v3043_v54 }
 0x487   :  { %2333 = vmatprep.subr.bf16.mxu1 %v3051_v15 }
 0x48a   :  { %2334 = vmatpush2.bf16.msra.mxu1 %v3049_v16 }
 0x48b   :  { %2335 = vmatprep.subr.bf16.mxu1 %v3057_v20 }
 0x48e   :  { %2336 = vmatpush2.bf16.msra.mxu1 %v3055_v22 }
 0x48f   :  { %2337 = vmatprep.subr.bf16.mxu1 %v3060_v57 }
 0x492   :  { %2338 = vmatpush2.bf16.msra.mxu1 %v3058_v8 }
 0x493   :  { %2339 = vmatprep.subr.bf16.mxu1 %v3063_v23 }
 0x496   :  { %2340 = vmatpush2.bf16.msra.mxu1 %v3061_v13 }
 0x497   :  { %2341 = vmatprep.subr.bf16.mxu1 %v3066_v7 }
 0x49a   :  { %2342 = vmatpush2.bf16.msra.mxu1 %v3064_v14 }
 0x50d   :  { %v1818_v30 = vpop.f32.mrf.mxu1 }
 0x50e   :  { %v1819_v31 = vadd.f32 %v1818_v30, %v1684_v28 }
 0x50f   :  { %v1820_v32 = vpop.f32.mrf.mxu1 }
 0x510   :  { %v1821_v36 = vadd.f32 %v1820_v32, %v1688_v29  ;;  %v1866_v33 = vmax.f32 %v1819_v31, 0.0 }
 0x511   :  { %v1822_v34 = vpop.f32.mrf.mxu1 }
 0x512   :  { %v1867_v39 = vmax.f32 %v1821_v36, 0.0  ;;  %v1870_v38 = vpack.c.bf16 %v1866_v33, %v1866_v33 }
 0x513   :  { %v1823_v37 = vpop.f32.mrf.mxu1 }
 0x514   :  { %v1871_v50 = vpack.c.bf16 %v1867_v39, %v1867_v39 }
 0x516   :  { %2302 = vmatprep.mubr.bf16.mxu0 %v1871_v50 }
 0x517   :  { %2303 = vmatmul.mubr.bf16.vlgmr.msra.gmra.mxu0 %v1870_v38 }
 0x51d   :  { %v1859_v43 = vpop.f32.mrf.mxu1 }
 0x51e   :  { %v1860_v45 = vadd.f32 %v1859_v43, %v1692_v41 }
 0x51f   :  { %v1861_v46 = vpop.f32.mrf.mxu1 }
 0x520   :  { %v1862_v47 = vadd.f32 %v1861_v46, %v1696_v42  ;;  %v1868_v48 = vmax.f32 %v1860_v45, 0.0 }
 0x521   :  { %v1863_v49 = vpop.f32.mrf.mxu1 }
 0x522   :  { %v1869_v1 = vmax.f32 %v1862_v47, 0.0  ;;  %v1872_v18 = vpack.c.bf16 %v1868_v48, %v1868_v48 }
 0x523   :  { %v1864_v51 = vpop.f32.mrf.mxu1 }
 0x524   :  { %v1873_v56 = vpack.c.bf16 %v1869_v1, %v1869_v1 }
 0x526   :  { %2343 = vmatprep.mubr.bf16.mxu1 %v1873_v56 }
 0x527   :  { %2344 = vmatmul.mubr.bf16.vlgmr.msra.gmra.mxu1 %v1872_v18 }
 0x5d7   :  { %v2304_v21 = vpop.f32.mrf.mxu0 }
 0x5d8   :  { %v2305_v24 = vadd.f32 %v2304_v21, %v1943_v4 }
 0x5d9   :  { %v2306_v60 = vpop.f32.mrf.mxu0 }
 0x5da   :  { %v2307_v9 = vadd.f32 %v2306_v60, %v1947_v5 }
 0x5db   :  { %v2308_v63 = vpop.f32.mrf.mxu0 }
 0x5dd   :  { %v2309_v0 = vpop.f32.mrf.mxu0 }
 0x5e7   :  { %v2345_v6 = vpop.f32.mrf.mxu1 }
 0x5e8   :  { %v2346_v59 = vadd.f32 %v2345_v6, %v2305_v24 }
 0x5e9   :  { %v2347_v52 = vpop.f32.mrf.mxu1 }
 0x5ea   :  { %v2348_v62 = vadd.f32 %v2347_v52, %v2307_v9 }
 0x5eb   :  { %v2349_v11 = vpop.f32.mrf.mxu1 }
 0x5ec   :  { %v2354_v12 = vcombine.low %v2346_v59, %v2348_v62 }
 0x5ed   :  { %v2350_v61 = vpop.f32.mrf.mxu1 }
 0x5ee   :  { %2584 = vst.sshfl [vmem:[#allocation2] sm:$0x33 pattern:$0x76325410] %v2354_v12 }
 0x5ef   :  { %3078 = shalt.err (!%p3075_p4)
}
 0x5f0   :  { %2373 = dma.vmem_to_hbm [thread:$0]  %s2371_s18, 64, %s4010_s11, [#allocation3]  }
 0x5f1   :  { %3087 = dma.done.wait [#allocation3], 64  }
 0x5f2   :  { %3088 = vsyncadd [#allocation3], 4294967232 }
 0x5f3   :  { %2377 = vsyncpa [#allocation3], 1 }

</bundles_post_ra>
